<compile_context>
chip_gen: v7x
topology: tpu7x:2x2x1
jax: 0.10.0
libtpu: 0.0.40
codegen_flags: <defaults>
</compile_context>

<pallas_src>
import jax
import jax.numpy as jnp
from jax.experimental import pallas as pl
from jax.experimental.pallas import tpu as pltpu


# ----------------------------------------------------------------------------
# Kernel 1: encoder + init transforms + dual-decoder recurrence (serial chain).
# Emits the per-step decoder hidden states; vocab heads are handled by kernel 2.
# ----------------------------------------------------------------------------
def dual_recurrence_kernel(
    # sequences (time-major)
    src_emb_ref,       # (Ts, B, Il)  embedded source tokens
    src_len_ref,       # (B, 1) int32 source lengths (packed-seq masking)
    ans_emb_ref,       # (T,  B, Il)  embedded target tokens (teacher forcing)
    par_emb_ref,       # (T,  B, Ip)  embedded parse tokens  (teacher forcing)
    # fused LSTM weights, gate order i|f|g|o along the 4H axis, pre-transposed for x @ W
    enc_wih_ref,       # (Il, 4H)
    enc_whh_ref,       # (H,  4H)
    enc_b_ref,         # (1,  4H)   b_ih + b_hh, forget-gate slice zeroed
    pdec_wih_par_ref,  # (Ip, 4H)
    pdec_wih_lex_ref,  # (Il, 4H)
    pdec_whh_ref,      # (H,  4H)
    pdec_b_ref,        # (1,  4H)
    dec_wih_par_ref,   # (Ip, 4H)
    dec_wih_lex_ref,   # (Il, 4H)
    dec_whh_ref,       # (H,  4H)
    dec_b_ref,         # (1,  4H)
    # hidden/cell init transforms, stacked as [hidden, cell, p_hidden, p_cell]
    fc1_w_ref,         # (4, H, 2H)
    fc1_b_ref,         # (4, 1, 2H)
    fc2_w_ref,         # (4, 2H, H)
    fc2_b_ref,         # (4, 1, H)
    # outputs (time-major)
    hd_out_ref,        # (T-1, B, H)  decoder hidden per step
    hp_out_ref,        # (T-1, B, H)  p_decoder hidden per step
):
    f32 = jnp.float32
    Ts, B, _ = src_emb_ref.shape
    T = ans_emb_ref.shape[0]
    H = enc_whh_ref.shape[0]

    def cell_update(pre, c):
        # pre: (B, 4H) fused pre-activation, torch gate order i|f|g|o
        i = jax.nn.sigmoid(pre[:, 0 * H:1 * H])
        f = jax.nn.sigmoid(pre[:, 1 * H:2 * H])
        g = jnp.tanh(pre[:, 2 * H:3 * H])
        o = jax.nn.sigmoid(pre[:, 3 * H:4 * H])
        c_new = f * c + i * g
        h_new = o * jnp.tanh(c_new)
        return h_new, c_new

    # ---- hoisted weight loads (resident in vregs/VMEM for the whole loops) ----
    enc_wih = enc_wih_ref[...]
    enc_whh = enc_whh_ref[...]
    enc_b = enc_b_ref[...]
    src_len = src_len_ref[...]                       # (B, 1) int32

    # ---- encoder LSTM over the padded source; length mask reproduces the final
    #      hidden/cell of pack_padded_sequence + nn.LSTM ----
    def enc_body(t, carry):
        h, c = carry
        x = src_emb_ref[t]                           # (B, Il)
        pre = (jnp.dot(x, enc_wih, preferred_element_type=f32)
               + jnp.dot(h, enc_whh, preferred_element_type=f32)
               + enc_b)
        h_new, c_new = cell_update(pre, c)
        keep = t < src_len                           # (B, 1) bool, broadcasts over H
        h = jnp.where(keep, h_new, h)
        c = jnp.where(keep, c_new, c)
        return (h, c)

    zeros = jnp.zeros((B, H), f32)
    h_enc, c_enc = jax.lax.fori_loop(0, Ts, enc_body, (zeros, zeros))

    # ---- init_hidden / p_init_hidden: Linear -> ReLU -> Linear ----
    def transform(x, k):
        a = jnp.dot(x, fc1_w_ref[k], preferred_element_type=f32) + fc1_b_ref[k]
        a = jnp.maximum(a, 0.0)
        return jnp.dot(a, fc2_w_ref[k], preferred_element_type=f32) + fc2_b_ref[k]

    h_d, c_d = transform(h_enc, 0), transform(c_enc, 1)
    h_p, c_p = transform(h_enc, 2), transform(c_enc, 3)

    # decoder weights loaded once, outside the serial loop
    w_p_par = pdec_wih_par_ref[...]
    w_p_lex = pdec_wih_lex_ref[...]
    w_p_hh = pdec_whh_ref[...]
    b_p = pdec_b_ref[...]
    w_d_par = dec_wih_par_ref[...]
    w_d_lex = dec_wih_lex_ref[...]
    w_d_hh = dec_whh_ref[...]
    b_d = dec_b_ref[...]

    # ---- teacher-forced dual decoder loop (trg_l - 1 steps) ----
    def dec_body(step, carry):
        h_d, c_d, h_p, c_p = carry
        x_lex = ans_emb_ref[step]                    # decoder_input   = ans_embed[:, step]
        x_par = par_emb_ref[step]                    # p_decoder_input = parse_embed[:, step]
        x_par_next = par_emb_ref[step + 1]           # parse_embed[:, step + 1]

        # Both decoders' fused pre-activations issued back-to-back: independent MXU
        # chains interleave in the pipeline instead of alternating stalls.
        pre_p = (jnp.dot(x_par, w_p_par, preferred_element_type=f32)
                 + jnp.dot(x_lex, w_p_lex, preferred_element_type=f32)
                 + jnp.dot(h_p, w_p_hh, preferred_element_type=f32)
                 + b_p)
        pre_d = (jnp.dot(x_par_next, w_d_par, preferred_element_type=f32)
                 + jnp.dot(x_lex, w_d_lex, preferred_element_type=f32)
                 + jnp.dot(h_d, w_d_hh, preferred_element_type=f32)
                 + b_d)

        h_p, c_p = cell_update(pre_p, c_p)
        h_d, c_d = cell_update(pre_d, c_d)

        hp_out_ref[step] = h_p
        hd_out_ref[step] = h_d
        return (h_d, c_d, h_p, c_p)

    jax.lax.fori_loop(0, T - 1, dec_body, (h_d, c_d, h_p, c_p))


# ----------------------------------------------------------------------------
# Kernel 2: batched head projection  logits = (h @ w_head + b_head) @ w_vocab + b_vocab
# Gridded over (row blocks, vocab blocks); the intermediate feature is computed once
# per row block (vocab index 0) and kept in VMEM scratch.
# ----------------------------------------------------------------------------
def _head_kernel(h_ref, wh_ref, bh_ref, wv_ref, bv_ref, out_ref, feat_sc):
    @pl.when(pl.program_id(1) == 0)
    def _():
        feat_sc[...] = (jnp.dot(h_ref[...], wh_ref[...],
                                preferred_element_type=jnp.float32)
                        + bh_ref[...])
    out_ref[...] = (jnp.dot(feat_sc[...], wv_ref[...],
                            preferred_element_type=jnp.float32)
                    + bv_ref[...]).astype(out_ref.dtype)


def _pick_tile(n, preferred):
    for c in preferred:
        if c <= n and n % c == 0:
            return c
    return n


def _vmem_limit(total_bytes):
    return int(min(64 * 2**20, max(16 * 2**20, 2 * total_bytes)))


def _head_projection(h_flat, w_head, b_head, w_voc, b_voc):
    M, H = h_flat.shape
    I = w_head.shape[1]
    V = w_voc.shape[1]
    Mt = M if M <= 256 else _pick_tile(M, [256, 128, 64, 32, 16, 8])
    Vt = V if V <= 512 else _pick_tile(V, [1024, 512, 256, 128])
    grid = (M // Mt, V // Vt)

    flops = 2 * M * H * I + 2 * M * I * V
    bytes_accessed = 4 * (M * H + H * I + I + I * V + V + M * V)
    block_bytes = 4 * (Mt * H + H * I + I + I * Vt + Vt + Mt * Vt + Mt * I)

    return pl.pallas_call(
        _head_kernel,
        out_shape=jax.ShapeDtypeStruct((M, V), jnp.float32),
        grid_spec=pltpu.PrefetchScalarGridSpec(
            num_scalar_prefetch=0,
            grid=grid,
            in_specs=[
                pl.BlockSpec((Mt, H), lambda m, v: (m, 0)),
                pl.BlockSpec((H, I), lambda m, v: (0, 0)),
                pl.BlockSpec((1, I), lambda m, v: (0, 0)),
                pl.BlockSpec((I, Vt), lambda m, v: (0, v)),
                pl.BlockSpec((1, Vt), lambda m, v: (0, v)),
            ],
            out_specs=pl.BlockSpec((Mt, Vt), lambda m, v: (m, v)),
            scratch_shapes=[pltpu.VMEM((Mt, I), jnp.float32)],
        ),
        compiler_params=pltpu.CompilerParams(
            dimension_semantics=("parallel", "arbitrary"),
            vmem_limit_bytes=_vmem_limit(4 * block_bytes)),
        cost_estimate=pl.CostEstimate(flops=flops, transcendentals=0,
                                      bytes_accessed=bytes_accessed),
    )(h_flat, w_head, b_head, w_voc, b_voc)


# ----------------------------------------------------------------------------
# Wrapper
# ----------------------------------------------------------------------------
def dual_decoder_forward(params, src_seqs, src_lengths, trg_seqs, parse_seqs):
    """Returns (decoder_outputs (B, T-1, V), p_decoder_outputs (B, T-1, PV)).

    Assumes parse_seqs has the same length as trg_seqs (the torch loop requires
    parse_l >= trg_l). sampling_rate is ignored: the scheduled-sampling branch is
    commented out in the original forward, so the active path is pure teacher forcing.
    """
    embed_w = params["embed_w"]               # (V, Il)
    parse_embed_w = params["parse_embed_w"]   # (PV, Ip)

    # Embedding lookups (padding_idx row 0 is zero) done as XLA gathers in the wrapper.
    src_emb = embed_w[src_seqs]               # (B, Ts, Il)
    ans_emb = embed_w[trg_seqs]               # (B, T,  Il)
    par_emb = parse_embed_w[parse_seqs]       # (B, T,  Ip)

    B, Ts, _ = src_emb.shape
    T = ans_emb.shape[1]
    H = params["enc_whh"].shape[0]
    V = params["b_wd"].shape[-1]
    PV = params["b_pd"].shape[-1]

    # Time-major layouts so the kernel indexes the leading axis per step.
    src_emb_tm = jnp.transpose(src_emb, (1, 0, 2))
    ans_emb_tm = jnp.transpose(ans_emb, (1, 0, 2))
    par_emb_tm = jnp.transpose(par_emb, (1, 0, 2))
    src_len = src_lengths.astype(jnp.int32).reshape(B, 1)

    recur_inputs = (
        src_emb_tm, src_len, ans_emb_tm, par_emb_tm,
        params["enc_wih"], params["enc_whh"], params["enc_b"],
        params["pdec_wih_par"], params["pdec_wih_lex"],
        params["pdec_whh"], params["pdec_b"],
        params["dec_wih_par"], params["dec_wih_lex"],
        params["dec_whh"], params["dec_b"],
        params["fc1_w"], params["fc1_b"], params["fc2_w"], params["fc2_b"],
    )
    in_bytes = sum(int(a.size) * a.dtype.itemsize for a in recur_inputs)
    out_bytes = 2 * (T - 1) * B * H * 4

    Il = src_emb.shape[2]
    Ip = par_emb.shape[2]
    flops_recur = (Ts * 2 * B * (Il + H) * 4 * H
                   + 4 * 2 * B * (H * 2 * H + 2 * H * H)
                   + (T - 1) * 2 * 2 * B * (Ip + Il + H) * 4 * H)
    trans_recur = (Ts + 2 * (T - 1)) * B * 5 * H

    vmem = pl.BlockSpec(memory_space=pltpu.MemorySpace.VMEM)
    hd_tm, hp_tm = pl.pallas_call(
        dual_recurrence_kernel,
        out_shape=(jax.ShapeDtypeStruct((T - 1, B, H), jnp.float32),
                   jax.ShapeDtypeStruct((T - 1, B, H), jnp.float32)),
        in_specs=[vmem] * len(recur_inputs),
        out_specs=(vmem, vmem),
        compiler_params=pltpu.CompilerParams(
            vmem_limit_bytes=_vmem_limit(in_bytes + out_bytes)),
        cost_estimate=pl.CostEstimate(flops=flops_recur,
                                      transcendentals=trans_recur,
                                      bytes_accessed=in_bytes + out_bytes),
    )(*recur_inputs)

    # Batched head projections over all (T-1)*B steps (outside the serial recurrence).
    M = (T - 1) * B
    hd_flat = hd_tm.reshape(M, H)
    hp_flat = hp_tm.reshape(M, H)

    dec_logits = _head_projection(hd_flat, params["w_out_t"], params["b_out"],
                                  params["w_wd_t"], params["b_wd"])
    p_logits = _head_projection(hp_flat, params["w_pout_t"], params["b_pout"],
                                params["w_pd_t"], params["b_pd"])

    dec_out = jnp.transpose(dec_logits.reshape(T - 1, B, V), (1, 0, 2))
    p_out = jnp.transpose(p_logits.reshape(T - 1, B, PV), (1, 0, 2))
    return dec_out, p_out


# ----------------------------------------------------------------------------
# Parameters (synthetic, matching the torch module's shapes / ties)
# ----------------------------------------------------------------------------
def init_params(key, lex_input_size, parse_input_size, hidden_size,
                vocab_size, parse_vocab_size):
    H = hidden_size
    keys = iter(jax.random.split(key, 64))
    scale = 0.1

    def rnd(shape):
        return jax.random.normal(next(keys), shape, jnp.float32) * scale

    # Embeddings (padding_idx = 0 row zeroed, as in the custom Embedding class).
    embed_w = rnd((vocab_size, lex_input_size)).at[0].set(0.0)
    parse_embed_w = rnd((parse_vocab_size, parse_input_size)).at[0].set(0.0)

    def lstm_params(in_size):
        # torch layout: weight_ih (4H, in), weight_hh (4H, H), bias_ih/bias_hh (4H,)
        w_ih = rnd((4 * H, in_size))
        w_hh = rnd((4 * H, H))
        b_ih = rnd((4 * H,))
        b_hh = rnd((4 * H,))
        # init_forget_bias(rnn, 0) zeroes the [H:2H] slice of EVERY bias (ih and hh).
        b_ih = b_ih.at[H:2 * H].set(0.0)
        b_hh = b_hh.at[H:2 * H].set(0.0)
        # fused, pre-transposed layout: (in, 4H), (H, 4H), (1, 4H); gate order i|f|g|o
        return jnp.transpose(w_ih), jnp.transpose(w_hh), (b_ih + b_hh)[None, :]

    enc_wih, enc_whh, enc_b = lstm_params(lex_input_size)
    pdec_wih, pdec_whh, pdec_b = lstm_params(parse_input_size + lex_input_size)
    dec_wih, dec_whh, dec_b = lstm_params(parse_input_size + lex_input_size)

    def fc_pair():
        # nn.Linear(H, 2H) then nn.Linear(2H, H), stored pre-transposed
        w1, b1 = rnd((2 * H, H)), rnd((2 * H,))
        w2, b2 = rnd((H, 2 * H)), rnd((H,))
        return jnp.transpose(w1), b1[None, :], jnp.transpose(w2), b2[None, :]

    fcs = [fc_pair() for _ in range(4)]   # order: hidden, cell, p_hidden, p_cell

    w_out, b_out = rnd((lex_input_size, H)), rnd((lex_input_size,))
    w_pout, b_pout = rnd((parse_input_size, H)), rnd((parse_input_size,))

    Ip = parse_input_size
    return {
        "embed_w": embed_w,
        "parse_embed_w": parse_embed_w,
        "enc_wih": enc_wih, "enc_whh": enc_whh, "enc_b": enc_b,
        # torch cat order in forward() is (parse, lex)
        "pdec_wih_par": pdec_wih[:Ip], "pdec_wih_lex": pdec_wih[Ip:],
        "pdec_whh": pdec_whh, "pdec_b": pdec_b,
        "dec_wih_par": dec_wih[:Ip], "dec_wih_lex": dec_wih[Ip:],
        "dec_whh": dec_whh, "dec_b": dec_b,
        "fc1_w": jnp.stack([f[0] for f in fcs]),
        "fc1_b": jnp.stack([f[1] for f in fcs]),
        "fc2_w": jnp.stack([f[2] for f in fcs]),
        "fc2_b": jnp.stack([f[3] for f in fcs]),
        "w_out_t": jnp.transpose(w_out),             # (H, Il)
        "b_out": b_out[None, :],
        "w_pout_t": jnp.transpose(w_pout),           # (H, Ip)
        "b_pout": b_pout[None, :],
        "w_wd_t": jnp.transpose(embed_w),            # word_dist.weight tied to embed.weight
        "b_wd": rnd((vocab_size,))[None, :],
        "w_pd_t": jnp.transpose(parse_embed_w),      # parse_dist.weight tied to parse_embed
        "b_pd": rnd((parse_vocab_size,))[None, :],
    }


# ----------------------------------------------------------------------------
# Pure-JAX reference mirroring torch.nn.LSTM / Linear semantics (fp32, HIGHEST).
# ----------------------------------------------------------------------------
def _reference_forward(params, src_seqs, src_lengths, trg_seqs, parse_seqs):
    hp = jax.lax.Precision.HIGHEST
    embed_w, parse_embed_w = params["embed_w"], params["parse_embed_w"]
    src_emb, ans_emb, par_emb = embed_w[src_seqs], embed_w[trg_seqs], parse_embed_w[parse_seqs]
    B, Ts, _ = src_emb.shape
    T = ans_emb.shape[1]
    H = params["enc_whh"].shape[0]

    def cell_update(pre, c):
        i = jax.nn.sigmoid(pre[:, :H])
        f = jax.nn.sigmoid(pre[:, H:2 * H])
        g = jnp.tanh(pre[:, 2 * H:3 * H])
        o = jax.nn.sigmoid(pre[:, 3 * H:])
        c_new = f * c + i * g
        return o * jnp.tanh(c_new), c_new

    h = jnp.zeros((B, H), jnp.float32)
    c = jnp.zeros((B, H), jnp.float32)
    for t in range(Ts):
        pre = (jnp.dot(src_emb[:, t], params["enc_wih"], precision=hp)
               + jnp.dot(h, params["enc_whh"], precision=hp) + params["enc_b"])
        h_new, c_new = cell_update(pre, c)
        m = (t < src_lengths).astype(jnp.float32)[:, None]
        h = m * h_new + (1.0 - m) * h
        c = m * c_new + (1.0 - m) * c

    def transform(x, k):
        a = jnp.maximum(jnp.dot(x, params["fc1_w"][k], precision=hp) + params["fc1_b"][k], 0.0)
        return jnp.dot(a, params["fc2_w"][k], precision=hp) + params["fc2_b"][k]

    h_d, c_d = transform(h, 0), transform(c, 1)
    h_p, c_p = transform(h, 2), transform(c, 3)

    dec_outs, p_outs = [], []
    for step in range(T - 1):
        x_lex, x_par, x_par_next = ans_emb[:, step], par_emb[:, step], par_emb[:, step + 1]
        pre_p = (jnp.dot(x_par, params["pdec_wih_par"], precision=hp)
                 + jnp.dot(x_lex, params["pdec_wih_lex"], precision=hp)
                 + jnp.dot(h_p, params["pdec_whh"], precision=hp) + params["pdec_b"])
        h_p, c_p = cell_update(pre_p, c_p)
        pf = jnp.dot(h_p, params["w_pout_t"], precision=hp) + params["b_pout"]
        p_outs.append(jnp.dot(pf, params["w_pd_t"], precision=hp) + params["b_pd"])
        pre_d = (jnp.dot(x_par_next, params["dec_wih_par"], precision=hp)
                 + jnp.dot(x_lex, params["dec_wih_lex"], precision=hp)
                 + jnp.dot(h_d, params["dec_whh"], precision=hp) + params["dec_b"])
        h_d, c_d = cell_update(pre_d, c_d)
        df = jnp.dot(h_d, params["w_out_t"], precision=hp) + params["b_out"]
        dec_outs.append(jnp.dot(df, params["w_wd_t"], precision=hp) + params["b_wd"])
    return jnp.stack(dec_outs, axis=1), jnp.stack(p_outs, axis=1)


if __name__ == "__main__":
    # Small shapes consistent with the module (B multiple of 8, vocab multiple of 128).
    batch = 8
    lex_input_size = 32
    parse_input_size = 32
    hidden_size = 32
    vocab_size = 128
    parse_vocab_size = 128
    src_len_max = 6
    trg_len = 8            # trg_l == parse_l

    key = jax.random.PRNGKey(0)
    k_par, k_src, k_trg, k_parse = jax.random.split(key, 4)

    params = init_params(k_par, lex_input_size, parse_input_size, hidden_size,
                         vocab_size, parse_vocab_size)

    src_seqs = jax.random.randint(k_src, (batch, src_len_max), 1, vocab_size, dtype=jnp.int32)
    trg_seqs = jax.random.randint(k_trg, (batch, trg_len), 1, vocab_size, dtype=jnp.int32)
    parse_seqs = jax.random.randint(k_parse, (batch, trg_len), 1, parse_vocab_size, dtype=jnp.int32)
    src_lengths = jnp.array([6, 6, 5, 4, 3, 2, 2, 1], dtype=jnp.int32)  # sorted, as pack_padded needs

    fwd = jax.jit(dual_decoder_forward)
    dec_out, pdec_out = fwd(params, src_seqs, src_lengths, trg_seqs, parse_seqs)
    dec_out = jax.block_until_ready(dec_out)
    pdec_out = jax.block_until_ready(pdec_out)

    # Sanity check against the pure-JAX reference.
    ref_dec, ref_pdec = _reference_forward(params, src_seqs, src_lengths, trg_seqs, parse_seqs)
    assert dec_out.shape == (batch, trg_len - 1, vocab_size)
    assert pdec_out.shape == (batch, trg_len - 1, parse_vocab_size)
    assert jnp.allclose(dec_out, ref_dec, atol=1e-4, rtol=1e-4), \
        float(jnp.max(jnp.abs(dec_out - ref_dec)))
    assert jnp.allclose(pdec_out, ref_pdec, atol=1e-4, rtol=1e-4), \
        float(jnp.max(jnp.abs(pdec_out - ref_pdec)))

    print("KERNEL_OK")
</pallas_src>

<mosaic_0001>
module attributes {stable_mosaic.version = 11 : i64} {
  func.func @_head_kernel(%arg0: i32, %arg1: i32, %arg2: memref<56x32xf32, #tpu.memory_space<vmem>>, %arg3: memref<32x32xf32, #tpu.memory_space<vmem>>, %arg4: memref<1x32xf32, #tpu.memory_space<vmem>>, %arg5: memref<32x128xf32, #tpu.memory_space<vmem>>, %arg6: memref<1x128xf32, #tpu.memory_space<vmem>>, %arg7: memref<56x128xf32, #tpu.memory_space<vmem>>, %arg8: memref<56x32xf32, #tpu.memory_space<vmem>>) attributes {dimension_semantics = [#tpu.dimension_semantics<parallel>, #tpu.dimension_semantics<arbitrary>], iteration_bounds = array<i64: 1, 1>, scalar_prefetch = 0 : i64, scratch_operands = 1 : i64, tpu.core_type = #tpu.core_type<tc>, window_params = [{transform_indices = @transform_0, window_bounds = array<i64: 56, 32>}, {pipeline_mode = #tpu.pipeline_mode<synchronous>, transform_indices = @transform_1, window_bounds = array<i64: 32, 32>}, {pipeline_mode = #tpu.pipeline_mode<synchronous>, transform_indices = @transform_2, window_bounds = array<i64: 1, 32>}, {transform_indices = @transform_3, window_bounds = array<i64: 32, 128>}, {transform_indices = @transform_4, window_bounds = array<i64: 1, 128>}, {transform_indices = @transform_5, window_bounds = array<i64: 56, 128>}]} {
    %c0_i32 = arith.constant 0 : i32
    %0 = arith.cmpi eq, %arg1, %c0_i32 : i32
    %1 = arith.extui %0 : i1 to i32
    %c0_i32_0 = arith.constant 0 : i32
    %2 = arith.cmpi ne, %1, %c0_i32_0 : i32
    scf.if %2 {
      %c0_8 = arith.constant 0 : index
      %c0_9 = arith.constant 0 : index
      %10 = vector.load %arg2[%c0_8, %c0_9] : memref<56x32xf32, #tpu.memory_space<vmem>>, vector<56x32xf32>
      %c0_10 = arith.constant 0 : index
      %c0_11 = arith.constant 0 : index
      %11 = vector.load %arg3[%c0_10, %c0_11] : memref<32x32xf32, #tpu.memory_space<vmem>>, vector<32x32xf32>
      %cst_12 = arith.constant dense<0.000000e+00> : vector<56x32xf32>
      %12 = tpu.matmul %10, %11, %cst_12 {dimension_numbers = #tpu.dot_dimension_numbers<[1], [0], [0], [1], [0, 0, 1, 1], [], []>} : vector<56x32xf32>, vector<32x32xf32>, vector<56x32xf32> -> vector<56x32xf32>
      %c0_13 = arith.constant 0 : index
      %c0_14 = arith.constant 0 : index
      %13 = vector.load %arg4[%c0_13, %c0_14] : memref<1x32xf32, #tpu.memory_space<vmem>>, vector<1x32xf32>
      %14 = vector.broadcast %13 : vector<1x32xf32> to vector<56x32xf32>
      %15 = arith.addf %12, %14 : vector<56x32xf32>
      %c0_15 = arith.constant 0 : index
      %c0_16 = arith.constant 0 : index
      %16 = vector.load %arg8[%c0_15, %c0_16] : memref<56x32xf32, #tpu.memory_space<vmem>>, vector<56x32xf32>
      tpu.vector_store %arg8[%c0_15, %c0_16], %15 {strides = array<i32>} : memref<56x32xf32, #tpu.memory_space<vmem>>, vector<56x32xf32>,
    } else {
    }
    %c0 = arith.constant 0 : index
    %c0_1 = arith.constant 0 : index
    %3 = vector.load %arg8[%c0, %c0_1] : memref<56x32xf32, #tpu.memory_space<vmem>>, vector<56x32xf32>
    %c0_2 = arith.constant 0 : index
    %c0_3 = arith.constant 0 : index
    %4 = vector.load %arg5[%c0_2, %c0_3] : memref<32x128xf32, #tpu.memory_space<vmem>>, vector<32x128xf32>
    %cst = arith.constant dense<0.000000e+00> : vector<56x128xf32>
    %5 = tpu.matmul %3, %4, %cst {dimension_numbers = #tpu.dot_dimension_numbers<[1], [0], [0], [1], [0, 0, 1, 1], [], []>} : vector<56x32xf32>, vector<32x128xf32>, vector<56x128xf32> -> vector<56x128xf32>
    %c0_4 = arith.constant 0 : index
    %c0_5 = arith.constant 0 : index
    %6 = vector.load %arg6[%c0_4, %c0_5] : memref<1x128xf32, #tpu.memory_space<vmem>>, vector<1x128xf32>
    %7 = vector.broadcast %6 : vector<1x128xf32> to vector<56x128xf32>
    %8 = arith.addf %5, %7 : vector<56x128xf32>
    %c0_6 = arith.constant 0 : index
    %c0_7 = arith.constant 0 : index
    %9 = vector.load %arg7[%c0_6, %c0_7] : memref<56x128xf32, #tpu.memory_space<vmem>>, vector<56x128xf32>
    tpu.vector_store %arg7[%c0_6, %c0_7], %8 {strides = array<i32>} : memref<56x128xf32, #tpu.memory_space<vmem>>, vector<56x128xf32>,
    return
  }
  func.func @transform_0(%arg0: i32, %arg1: i32) -> (i32, i32) {
    %c0_i32 = arith.constant 0 : i32
    %c0_i32_0 = arith.constant 0 : i32
    return %arg0, %c0_i32 : i32, i32
  }
  func.func @transform_1(%arg0: i32, %arg1: i32) -> (i32, i32) {
    %c0_i32 = arith.constant 0 : i32
    %c0_i32_0 = arith.constant 0 : i32
    %c0_i32_1 = arith.constant 0 : i32
    return %c0_i32, %c0_i32_0 : i32, i32
  }
  func.func @transform_2(%arg0: i32, %arg1: i32) -> (i32, i32) {
    %c0_i32 = arith.constant 0 : i32
    %c0_i32_0 = arith.constant 0 : i32
    %c0_i32_1 = arith.constant 0 : i32
    return %c0_i32, %c0_i32_0 : i32, i32
  }
  func.func @transform_3(%arg0: i32, %arg1: i32) -> (i32, i32) {
    %c0_i32 = arith.constant 0 : i32
    %c0_i32_0 = arith.constant 0 : i32
    return %c0_i32, %arg1 : i32, i32
  }
  func.func @transform_4(%arg0: i32, %arg1: i32) -> (i32, i32) {
    %c0_i32 = arith.constant 0 : i32
    %c0_i32_0 = arith.constant 0 : i32
    return %c0_i32, %arg1 : i32, i32
  }
  func.func @transform_5(%arg0: i32, %arg1: i32) -> (i32, i32) {
    %c0_i32 = arith.constant 0 : i32
    return %arg0, %arg1 : i32, i32
  }
}

module attributes {stable_mosaic.version = 11 : i64} {
  func.func @dual_recurrence_kernel(%arg0: memref<6x8x32xf32, #tpu.memory_space<vmem>>, %arg1: memref<8x1xi32, #tpu.memory_space<vmem>>, %arg2: memref<8x8x32xf32, #tpu.memory_space<vmem>>, %arg3: memref<8x8x32xf32, #tpu.memory_space<vmem>>, %arg4: memref<32x128xf32, #tpu.memory_space<vmem>>, %arg5: memref<32x128xf32, #tpu.memory_space<vmem>>, %arg6: memref<1x128xf32, #tpu.memory_space<vmem>>, %arg7: memref<32x128xf32, #tpu.memory_space<vmem>>, %arg8: memref<32x128xf32, #tpu.memory_space<vmem>>, %arg9: memref<32x128xf32, #tpu.memory_space<vmem>>, %arg10: memref<1x128xf32, #tpu.memory_space<vmem>>, %arg11: memref<32x128xf32, #tpu.memory_space<vmem>>, %arg12: memref<32x128xf32, #tpu.memory_space<vmem>>, %arg13: memref<32x128xf32, #tpu.memory_space<vmem>>, %arg14: memref<1x128xf32, #tpu.memory_space<vmem>>, %arg15: memref<4x32x64xf32, #tpu.memory_space<vmem>>, %arg16: memref<4x1x64xf32, #tpu.memory_space<vmem>>, %arg17: memref<4x64x32xf32, #tpu.memory_space<vmem>>, %arg18: memref<4x1x32xf32, #tpu.memory_space<vmem>>, %arg19: memref<7x8x32xf32, #tpu.memory_space<vmem>>, %arg20: memref<7x8x32xf32, #tpu.memory_space<vmem>>) attributes {dimension_semantics = [], scalar_prefetch = 0 : i64, scratch_operands = 0 : i64, tpu.core_type = #tpu.core_type<tc>} {
    %c0 = arith.constant 0 : index
    %c0_0 = arith.constant 0 : index
    %0 = vector.load %arg4[%c0, %c0_0] : memref<32x128xf32, #tpu.memory_space<vmem>>, vector<32x128xf32>
    %c0_1 = arith.constant 0 : index
    %c0_2 = arith.constant 0 : index
    %1 = vector.load %arg5[%c0_1, %c0_2] : memref<32x128xf32, #tpu.memory_space<vmem>>, vector<32x128xf32>
    %c0_3 = arith.constant 0 : index
    %c0_4 = arith.constant 0 : index
    %2 = vector.load %arg6[%c0_3, %c0_4] : memref<1x128xf32, #tpu.memory_space<vmem>>, vector<1x128xf32>
    %c0_5 = arith.constant 0 : index
    %c0_6 = arith.constant 0 : index
    %3 = vector.load %arg1[%c0_5, %c0_6] : memref<8x1xi32, #tpu.memory_space<vmem>>, vector<8x1xi32>
    %cst = arith.constant 0.000000e+00 : f32
    %4 = vector.broadcast %cst : f32 to vector<8x32xf32>
    %c0_i32 = arith.constant 0 : i32
    %c6_i32 = arith.constant 6 : i32
    %5 = arith.addi %c0_i32, %c6_i32 : i32
    %c1_i32 = arith.constant 1 : i32
    %6:2 = scf.for %arg21 = %c0_i32 to %5 step %c1_i32 iter_args(%arg22 = %4, %arg23 = %4) -> (vector<8x32xf32>, vector<8x32xf32>)  : i32 {
      %81 = arith.index_cast %arg21 : i32 to index
      %c0_84 = arith.constant 0 : index
      %c0_85 = arith.constant 0 : index
      %82 = vector.load %arg0[%81, %c0_84, %c0_85] : memref<6x8x32xf32, #tpu.memory_space<vmem>>, vector<1x8x32xf32>
      %83 = vector.shape_cast %82 : vector<1x8x32xf32> to vector<8x32xf32>
      %cst_86 = arith.constant dense<0.000000e+00> : vector<8x128xf32>
      %84 = tpu.matmul %83, %0, %cst_86 {dimension_numbers = #tpu.dot_dimension_numbers<[1], [0], [0], [1], [0, 0, 1, 1], [], []>} : vector<8x32xf32>, vector<32x128xf32>, vector<8x128xf32> -> vector<8x128xf32>
      %cst_87 = arith.constant dense<0.000000e+00> : vector<8x128xf32>
      %85 = tpu.matmul %arg22, %1, %cst_87 {dimension_numbers = #tpu.dot_dimension_numbers<[1], [0], [0], [1], [0, 0, 1, 1], [], []>} : vector<8x32xf32>, vector<32x128xf32>, vector<8x128xf32> -> vector<8x128xf32>
      %86 = arith.addf %84, %85 : vector<8x128xf32>
      %87 = vector.broadcast %2 : vector<1x128xf32> to vector<8x128xf32>
      %88 = arith.addf %86, %87 : vector<8x128xf32>
      %89 = vector.extract_strided_slice %88 {offsets = [0, 0], sizes = [8, 32], strides = [1, 1]} : vector<8x128xf32> to vector<8x32xf32>
      %90 = arith.negf %89 : vector<8x32xf32>
      %91 = math.exp %90 : vector<8x32xf32>
      %cst_88 = arith.constant 1.000000e+00 : f32
      %92 = vector.broadcast %cst_88 : f32 to vector<8x32xf32>
      %93 = arith.addf %92, %91 : vector<8x32xf32>
      %94 = arith.divf %92, %93 : vector<8x32xf32>
      %95 = vector.extract_strided_slice %88 {offsets = [0, 32], sizes = [8, 32], strides = [1, 1]} : vector<8x128xf32> to vector<8x32xf32>
      %96 = arith.negf %95 : vector<8x32xf32>
      %97 = math.exp %96 : vector<8x32xf32>
      %cst_89 = arith.constant 1.000000e+00 : f32
      %98 = vector.broadcast %cst_89 : f32 to vector<8x32xf32>
      %99 = arith.addf %98, %97 : vector<8x32xf32>
      %100 = arith.divf %98, %99 : vector<8x32xf32>
      %101 = vector.extract_strided_slice %88 {offsets = [0, 64], sizes = [8, 32], strides = [1, 1]} : vector<8x128xf32> to vector<8x32xf32>
      %102 = math.tanh %101 : vector<8x32xf32>
      %103 = vector.extract_strided_slice %88 {offsets = [0, 96], sizes = [8, 32], strides = [1, 1]} : vector<8x128xf32> to vector<8x32xf32>
      %104 = arith.negf %103 : vector<8x32xf32>
      %105 = math.exp %104 : vector<8x32xf32>
      %cst_90 = arith.constant 1.000000e+00 : f32
      %106 = vector.broadcast %cst_90 : f32 to vector<8x32xf32>
      %107 = arith.addf %106, %105 : vector<8x32xf32>
      %108 = arith.divf %106, %107 : vector<8x32xf32>
      %109 = arith.mulf %100, %arg23 : vector<8x32xf32>
      %110 = arith.mulf %94, %102 : vector<8x32xf32>
      %111 = arith.addf %109, %110 : vector<8x32xf32>
      %112 = math.tanh %111 : vector<8x32xf32>
      %113 = arith.mulf %108, %112 : vector<8x32xf32>
      %114 = vector.broadcast %arg21 : i32 to vector<8x1xi32>
      %115 = arith.cmpi slt, %114, %3 : vector<8x1xi32>
      %116 = vector.shape_cast %115 : vector<8x1xi1> to vector<8x1xi1>
      %117 = vector.broadcast %116 : vector<8x1xi1> to vector<8x32xi1>
      %118 = arith.select %117, %113, %arg22 : vector<8x32xi1>, vector<8x32xf32>
      %119 = vector.shape_cast %115 : vector<8x1xi1> to vector<8x1xi1>
      %120 = vector.broadcast %119 : vector<8x1xi1> to vector<8x32xi1>
      %121 = arith.select %120, %111, %arg23 : vector<8x32xi1>, vector<8x32xf32>
      scf.yield %118, %121 : vector<8x32xf32>, vector<8x32xf32>
    }
    %c6_i32_7 = arith.constant 6 : i32
    %c0_8 = arith.constant 0 : index
    %c0_9 = arith.constant 0 : index
    %c0_10 = arith.constant 0 : index
    %7 = vector.load %arg15[%c0_8, %c0_9, %c0_10] : memref<4x32x64xf32, #tpu.memory_space<vmem>>, vector<1x32x64xf32>
    %8 = vector.shape_cast %7 : vector<1x32x64xf32> to vector<32x64xf32>
    %cst_11 = arith.constant dense<0.000000e+00> : vector<8x64xf32>
    %9 = tpu.matmul %6#0, %8, %cst_11 {dimension_numbers = #tpu.dot_dimension_numbers<[1], [0], [0], [1], [0, 0, 1, 1], [], []>} : vector<8x32xf32>, vector<32x64xf32>, vector<8x64xf32> -> vector<8x64xf32>
    %c0_12 = arith.constant 0 : index
    %c0_13 = arith.constant 0 : index
    %c0_14 = arith.constant 0 : index
    %10 = vector.load %arg16[%c0_12, %c0_13, %c0_14] : memref<4x1x64xf32, #tpu.memory_space<vmem>>, vector<1x1x64xf32>
    %11 = vector.shape_cast %10 : vector<1x1x64xf32> to vector<1x64xf32>
    %12 = vector.broadcast %11 : vector<1x64xf32> to vector<8x64xf32>
    %13 = arith.addf %9, %12 : vector<8x64xf32>
    %cst_15 = arith.constant 0.000000e+00 : f32
    %14 = vector.broadcast %cst_15 : f32 to vector<8x64xf32>
    %15 = arith.maximumf %13, %14 : vector<8x64xf32>
    %c0_16 = arith.constant 0 : index
    %c0_17 = arith.constant 0 : index
    %c0_18 = arith.constant 0 : index
    %16 = vector.load %arg17[%c0_16, %c0_17, %c0_18] : memref<4x64x32xf32, #tpu.memory_space<vmem>>, vector<1x64x32xf32>
    %17 = vector.shape_cast %16 : vector<1x64x32xf32> to vector<64x32xf32>
    %cst_19 = arith.constant dense<0.000000e+00> : vector<8x32xf32>
    %18 = tpu.matmul %15, %17, %cst_19 {dimension_numbers = #tpu.dot_dimension_numbers<[1], [0], [0], [1], [0, 0, 1, 1], [], []>} : vector<8x64xf32>, vector<64x32xf32>, vector<8x32xf32> -> vector<8x32xf32>
    %c0_20 = arith.constant 0 : index
    %c0_21 = arith.constant 0 : index
    %c0_22 = arith.constant 0 : index
    %19 = vector.load %arg18[%c0_20, %c0_21, %c0_22] : memref<4x1x32xf32, #tpu.memory_space<vmem>>, vector<1x1x32xf32>
    %20 = vector.shape_cast %19 : vector<1x1x32xf32> to vector<1x32xf32>
    %21 = vector.broadcast %20 : vector<1x32xf32> to vector<8x32xf32>
    %22 = arith.addf %18, %21 : vector<8x32xf32>
    %c1 = arith.constant 1 : index
    %c0_23 = arith.constant 0 : index
    %c0_24 = arith.constant 0 : index
    %23 = vector.load %arg15[%c1, %c0_23, %c0_24] : memref<4x32x64xf32, #tpu.memory_space<vmem>>, vector<1x32x64xf32>
    %24 = vector.shape_cast %23 : vector<1x32x64xf32> to vector<32x64xf32>
    %cst_25 = arith.constant dense<0.000000e+00> : vector<8x64xf32>
    %25 = tpu.matmul %6#1, %24, %cst_25 {dimension_numbers = #tpu.dot_dimension_numbers<[1], [0], [0], [1], [0, 0, 1, 1], [], []>} : vector<8x32xf32>, vector<32x64xf32>, vector<8x64xf32> -> vector<8x64xf32>
    %c1_26 = arith.constant 1 : index
    %c0_27 = arith.constant 0 : index
    %c0_28 = arith.constant 0 : index
    %26 = vector.load %arg16[%c1_26, %c0_27, %c0_28] : memref<4x1x64xf32, #tpu.memory_space<vmem>>, vector<1x1x64xf32>
    %27 = vector.shape_cast %26 : vector<1x1x64xf32> to vector<1x64xf32>
    %28 = vector.broadcast %27 : vector<1x64xf32> to vector<8x64xf32>
    %29 = arith.addf %25, %28 : vector<8x64xf32>
    %cst_29 = arith.constant 0.000000e+00 : f32
    %30 = vector.broadcast %cst_29 : f32 to vector<8x64xf32>
    %31 = arith.maximumf %29, %30 : vector<8x64xf32>
    %c1_30 = arith.constant 1 : index
    %c0_31 = arith.constant 0 : index
    %c0_32 = arith.constant 0 : index
    %32 = vector.load %arg17[%c1_30, %c0_31, %c0_32] : memref<4x64x32xf32, #tpu.memory_space<vmem>>, vector<1x64x32xf32>
    %33 = vector.shape_cast %32 : vector<1x64x32xf32> to vector<64x32xf32>
    %cst_33 = arith.constant dense<0.000000e+00> : vector<8x32xf32>
    %34 = tpu.matmul %31, %33, %cst_33 {dimension_numbers = #tpu.dot_dimension_numbers<[1], [0], [0], [1], [0, 0, 1, 1], [], []>} : vector<8x64xf32>, vector<64x32xf32>, vector<8x32xf32> -> vector<8x32xf32>
    %c1_34 = arith.constant 1 : index
    %c0_35 = arith.constant 0 : index
    %c0_36 = arith.constant 0 : index
    %35 = vector.load %arg18[%c1_34, %c0_35, %c0_36] : memref<4x1x32xf32, #tpu.memory_space<vmem>>, vector<1x1x32xf32>
    %36 = vector.shape_cast %35 : vector<1x1x32xf32> to vector<1x32xf32>
    %37 = vector.broadcast %36 : vector<1x32xf32> to vector<8x32xf32>
    %38 = arith.addf %34, %37 : vector<8x32xf32>
    %c2 = arith.constant 2 : index
    %c0_37 = arith.constant 0 : index
    %c0_38 = arith.constant 0 : index
    %39 = vector.load %arg15[%c2, %c0_37, %c0_38] : memref<4x32x64xf32, #tpu.memory_space<vmem>>, vector<1x32x64xf32>
    %40 = vector.shape_cast %39 : vector<1x32x64xf32> to vector<32x64xf32>
    %cst_39 = arith.constant dense<0.000000e+00> : vector<8x64xf32>
    %41 = tpu.matmul %6#0, %40, %cst_39 {dimension_numbers = #tpu.dot_dimension_numbers<[1], [0], [0], [1], [0, 0, 1, 1], [], []>} : vector<8x32xf32>, vector<32x64xf32>, vector<8x64xf32> -> vector<8x64xf32>
    %c2_40 = arith.constant 2 : index
    %c0_41 = arith.constant 0 : index
    %c0_42 = arith.constant 0 : index
    %42 = vector.load %arg16[%c2_40, %c0_41, %c0_42] : memref<4x1x64xf32, #tpu.memory_space<vmem>>, vector<1x1x64xf32>
    %43 = vector.shape_cast %42 : vector<1x1x64xf32> to vector<1x64xf32>
    %44 = vector.broadcast %43 : vector<1x64xf32> to vector<8x64xf32>
    %45 = arith.addf %41, %44 : vector<8x64xf32>
    %cst_43 = arith.constant 0.000000e+00 : f32
    %46 = vector.broadcast %cst_43 : f32 to vector<8x64xf32>
    %47 = arith.maximumf %45, %46 : vector<8x64xf32>
    %c2_44 = arith.constant 2 : index
    %c0_45 = arith.constant 0 : index
    %c0_46 = arith.constant 0 : index
    %48 = vector.load %arg17[%c2_44, %c0_45, %c0_46] : memref<4x64x32xf32, #tpu.memory_space<vmem>>, vector<1x64x32xf32>
    %49 = vector.shape_cast %48 : vector<1x64x32xf32> to vector<64x32xf32>
    %cst_47 = arith.constant dense<0.000000e+00> : vector<8x32xf32>
    %50 = tpu.matmul %47, %49, %cst_47 {dimension_numbers = #tpu.dot_dimension_numbers<[1], [0], [0], [1], [0, 0, 1, 1], [], []>} : vector<8x64xf32>, vector<64x32xf32>, vector<8x32xf32> -> vector<8x32xf32>
    %c2_48 = arith.constant 2 : index
    %c0_49 = arith.constant 0 : index
    %c0_50 = arith.constant 0 : index
    %51 = vector.load %arg18[%c2_48, %c0_49, %c0_50] : memref<4x1x32xf32, #tpu.memory_space<vmem>>, vector<1x1x32xf32>
    %52 = vector.shape_cast %51 : vector<1x1x32xf32> to vector<1x32xf32>
    %53 = vector.broadcast %52 : vector<1x32xf32> to vector<8x32xf32>
    %54 = arith.addf %50, %53 : vector<8x32xf32>
    %c3 = arith.constant 3 : index
    %c0_51 = arith.constant 0 : index
    %c0_52 = arith.constant 0 : index
    %55 = vector.load %arg15[%c3, %c0_51, %c0_52] : memref<4x32x64xf32, #tpu.memory_space<vmem>>, vector<1x32x64xf32>
    %56 = vector.shape_cast %55 : vector<1x32x64xf32> to vector<32x64xf32>
    %cst_53 = arith.constant dense<0.000000e+00> : vector<8x64xf32>
    %57 = tpu.matmul %6#1, %56, %cst_53 {dimension_numbers = #tpu.dot_dimension_numbers<[1], [0], [0], [1], [0, 0, 1, 1], [], []>} : vector<8x32xf32>, vector<32x64xf32>, vector<8x64xf32> -> vector<8x64xf32>
    %c3_54 = arith.constant 3 : index
    %c0_55 = arith.constant 0 : index
    %c0_56 = arith.constant 0 : index
    %58 = vector.load %arg16[%c3_54, %c0_55, %c0_56] : memref<4x1x64xf32, #tpu.memory_space<vmem>>, vector<1x1x64xf32>
    %59 = vector.shape_cast %58 : vector<1x1x64xf32> to vector<1x64xf32>
    %60 = vector.broadcast %59 : vector<1x64xf32> to vector<8x64xf32>
    %61 = arith.addf %57, %60 : vector<8x64xf32>
    %cst_57 = arith.constant 0.000000e+00 : f32
    %62 = vector.broadcast %cst_57 : f32 to vector<8x64xf32>
    %63 = arith.maximumf %61, %62 : vector<8x64xf32>
    %c3_58 = arith.constant 3 : index
    %c0_59 = arith.constant 0 : index
    %c0_60 = arith.constant 0 : index
    %64 = vector.load %arg17[%c3_58, %c0_59, %c0_60] : memref<4x64x32xf32, #tpu.memory_space<vmem>>, vector<1x64x32xf32>
    %65 = vector.shape_cast %64 : vector<1x64x32xf32> to vector<64x32xf32>
    %cst_61 = arith.constant dense<0.000000e+00> : vector<8x32xf32>
    %66 = tpu.matmul %63, %65, %cst_61 {dimension_numbers = #tpu.dot_dimension_numbers<[1], [0], [0], [1], [0, 0, 1, 1], [], []>} : vector<8x64xf32>, vector<64x32xf32>, vector<8x32xf32> -> vector<8x32xf32>
    %c3_62 = arith.constant 3 : index
    %c0_63 = arith.constant 0 : index
    %c0_64 = arith.constant 0 : index
    %67 = vector.load %arg18[%c3_62, %c0_63, %c0_64] : memref<4x1x32xf32, #tpu.memory_space<vmem>>, vector<1x1x32xf32>
    %68 = vector.shape_cast %67 : vector<1x1x32xf32> to vector<1x32xf32>
    %69 = vector.broadcast %68 : vector<1x32xf32> to vector<8x32xf32>
    %70 = arith.addf %66, %69 : vector<8x32xf32>
    %c0_65 = arith.constant 0 : index
    %c0_66 = arith.constant 0 : index
    %71 = vector.load %arg7[%c0_65, %c0_66] : memref<32x128xf32, #tpu.memory_space<vmem>>, vector<32x128xf32>
    %c0_67 = arith.constant 0 : index
    %c0_68 = arith.constant 0 : index
    %72 = vector.load %arg8[%c0_67, %c0_68] : memref<32x128xf32, #tpu.memory_space<vmem>>, vector<32x128xf32>
    %c0_69 = arith.constant 0 : index
    %c0_70 = arith.constant 0 : index
    %73 = vector.load %arg9[%c0_69, %c0_70] : memref<32x128xf32, #tpu.memory_space<vmem>>, vector<32x128xf32>
    %c0_71 = arith.constant 0 : index
    %c0_72 = arith.constant 0 : index
    %74 = vector.load %arg10[%c0_71, %c0_72] : memref<1x128xf32, #tpu.memory_space<vmem>>, vector<1x128xf32>
    %c0_73 = arith.constant 0 : index
    %c0_74 = arith.constant 0 : index
    %75 = vector.load %arg11[%c0_73, %c0_74] : memref<32x128xf32, #tpu.memory_space<vmem>>, vector<32x128xf32>
    %c0_75 = arith.constant 0 : index
    %c0_76 = arith.constant 0 : index
    %76 = vector.load %arg12[%c0_75, %c0_76] : memref<32x128xf32, #tpu.memory_space<vmem>>, vector<32x128xf32>
    %c0_77 = arith.constant 0 : index
    %c0_78 = arith.constant 0 : index
    %77 = vector.load %arg13[%c0_77, %c0_78] : memref<32x128xf32, #tpu.memory_space<vmem>>, vector<32x128xf32>
    %c0_79 = arith.constant 0 : index
    %c0_80 = arith.constant 0 : index
    %78 = vector.load %arg14[%c0_79, %c0_80] : memref<1x128xf32, #tpu.memory_space<vmem>>, vector<1x128xf32>
    %c0_i32_81 = arith.constant 0 : i32
    %c7_i32 = arith.constant 7 : i32
    %79 = arith.addi %c0_i32_81, %c7_i32 : i32
    %c1_i32_82 = arith.constant 1 : i32
    %80:4 = scf.for %arg21 = %c0_i32_81 to %79 step %c1_i32_82 iter_args(%arg22 = %22, %arg23 = %38, %arg24 = %54, %arg25 = %70) -> (vector<8x32xf32>, vector<8x32xf32>, vector<8x32xf32>, vector<8x32xf32>)  : i32 {
      %81 = arith.index_cast %arg21 : i32 to index
      %c0_84 = arith.constant 0 : index
      %c0_85 = arith.constant 0 : index
      %82 = vector.load %arg2[%81, %c0_84, %c0_85] : memref<8x8x32xf32, #tpu.memory_space<vmem>>, vector<1x8x32xf32>
      %83 = vector.shape_cast %82 : vector<1x8x32xf32> to vector<8x32xf32>
      %84 = arith.index_cast %arg21 : i32 to index
      %c0_86 = arith.constant 0 : index
      %c0_87 = arith.constant 0 : index
      %85 = vector.load %arg3[%84, %c0_86, %c0_87] : memref<8x8x32xf32, #tpu.memory_space<vmem>>, vector<1x8x32xf32>
      %86 = vector.shape_cast %85 : vector<1x8x32xf32> to vector<8x32xf32>
      %c1_i32_88 = arith.constant 1 : i32
      %87 = arith.addi %arg21, %c1_i32_88 : i32
      %88 = arith.index_cast %87 : i32 to index
      %c0_89 = arith.constant 0 : index
      %c0_90 = arith.constant 0 : index
      %89 = vector.load %arg3[%88, %c0_89, %c0_90] : memref<8x8x32xf32, #tpu.memory_space<vmem>>, vector<1x8x32xf32>
      %90 = vector.shape_cast %89 : vector<1x8x32xf32> to vector<8x32xf32>
      %cst_91 = arith.constant dense<0.000000e+00> : vector<8x128xf32>
      %91 = tpu.matmul %86, %71, %cst_91 {dimension_numbers = #tpu.dot_dimension_numbers<[1], [0], [0], [1], [0, 0, 1, 1], [], []>} : vector<8x32xf32>, vector<32x128xf32>, vector<8x128xf32> -> vector<8x128xf32>
      %cst_92 = arith.constant dense<0.000000e+00> : vector<8x128xf32>
      %92 = tpu.matmul %83, %72, %cst_92 {dimension_numbers = #tpu.dot_dimension_numbers<[1], [0], [0], [1], [0, 0, 1, 1], [], []>} : vector<8x32xf32>, vector<32x128xf32>, vector<8x128xf32> -> vector<8x128xf32>
      %93 = arith.addf %91, %92 : vector<8x128xf32>
      %cst_93 = arith.constant dense<0.000000e+00> : vector<8x128xf32>
      %94 = tpu.matmul %arg24, %73, %cst_93 {dimension_numbers = #tpu.dot_dimension_numbers<[1], [0], [0], [1], [0, 0, 1, 1], [], []>} : vector<8x32xf32>, vector<32x128xf32>, vector<8x128xf32> -> vector<8x128xf32>
      %95 = arith.addf %93, %94 : vector<8x128xf32>
      %96 = vector.broadcast %74 : vector<1x128xf32> to vector<8x128xf32>
      %97 = arith.addf %95, %96 : vector<8x128xf32>
      %cst_94 = arith.constant dense<0.000000e+00> : vector<8x128xf32>
      %98 = tpu.matmul %90, %75, %cst_94 {dimension_numbers = #tpu.dot_dimension_numbers<[1], [0], [0], [1], [0, 0, 1, 1], [], []>} : vector<8x32xf32>, vector<32x128xf32>, vector<8x128xf32> -> vector<8x128xf32>
      %cst_95 = arith.constant dense<0.000000e+00> : vector<8x128xf32>
      %99 = tpu.matmul %83, %76, %cst_95 {dimension_numbers = #tpu.dot_dimension_numbers<[1], [0], [0], [1], [0, 0, 1, 1], [], []>} : vector<8x32xf32>, vector<32x128xf32>, vector<8x128xf32> -> vector<8x128xf32>
      %100 = arith.addf %98, %99 : vector<8x128xf32>
      %cst_96 = arith.constant dense<0.000000e+00> : vector<8x128xf32>
      %101 = tpu.matmul %arg22, %77, %cst_96 {dimension_numbers = #tpu.dot_dimension_numbers<[1], [0], [0], [1], [0, 0, 1, 1], [], []>} : vector<8x32xf32>, vector<32x128xf32>, vector<8x128xf32> -> vector<8x128xf32>
      %102 = arith.addf %100, %101 : vector<8x128xf32>
      %103 = vector.broadcast %78 : vector<1x128xf32> to vector<8x128xf32>
      %104 = arith.addf %102, %103 : vector<8x128xf32>
      %105 = vector.extract_strided_slice %97 {offsets = [0, 0], sizes = [8, 32], strides = [1, 1]} : vector<8x128xf32> to vector<8x32xf32>
      %106 = arith.negf %105 : vector<8x32xf32>
      %107 = math.exp %106 : vector<8x32xf32>
      %cst_97 = arith.constant 1.000000e+00 : f32
      %108 = vector.broadcast %cst_97 : f32 to vector<8x32xf32>
      %109 = arith.addf %108, %107 : vector<8x32xf32>
      %110 = arith.divf %108, %109 : vector<8x32xf32>
      %111 = vector.extract_strided_slice %97 {offsets = [0, 32], sizes = [8, 32], strides = [1, 1]} : vector<8x128xf32> to vector<8x32xf32>
      %112 = arith.negf %111 : vector<8x32xf32>
      %113 = math.exp %112 : vector<8x32xf32>
      %cst_98 = arith.constant 1.000000e+00 : f32
      %114 = vector.broadcast %cst_98 : f32 to vector<8x32xf32>
      %115 = arith.addf %114, %113 : vector<8x32xf32>
      %116 = arith.divf %114, %115 : vector<8x32xf32>
      %117 = vector.extract_strided_slice %97 {offsets = [0, 64], sizes = [8, 32], strides = [1, 1]} : vector<8x128xf32> to vector<8x32xf32>
      %118 = math.tanh %117 : vector<8x32xf32>
      %119 = vector.extract_strided_slice %97 {offsets = [0, 96], sizes = [8, 32], strides = [1, 1]} : vector<8x128xf32> to vector<8x32xf32>
      %120 = arith.negf %119 : vector<8x32xf32>
      %121 = math.exp %120 : vector<8x32xf32>
      %cst_99 = arith.constant 1.000000e+00 : f32
      %122 = vector.broadcast %cst_99 : f32 to vector<8x32xf32>
      %123 = arith.addf %122, %121 : vector<8x32xf32>
      %124 = arith.divf %122, %123 : vector<8x32xf32>
      %125 = arith.mulf %116, %arg25 : vector<8x32xf32>
      %126 = arith.mulf %110, %118 : vector<8x32xf32>
      %127 = arith.addf %125, %126 : vector<8x32xf32>
      %128 = math.tanh %127 : vector<8x32xf32>
      %129 = arith.mulf %124, %128 : vector<8x32xf32>
      %130 = vector.extract_strided_slice %104 {offsets = [0, 0], sizes = [8, 32], strides = [1, 1]} : vector<8x128xf32> to vector<8x32xf32>
      %131 = arith.negf %130 : vector<8x32xf32>
      %132 = math.exp %131 : vector<8x32xf32>
      %cst_100 = arith.constant 1.000000e+00 : f32
      %133 = vector.broadcast %cst_100 : f32 to vector<8x32xf32>
      %134 = arith.addf %133, %132 : vector<8x32xf32>
      %135 = arith.divf %133, %134 : vector<8x32xf32>
      %136 = vector.extract_strided_slice %104 {offsets = [0, 32], sizes = [8, 32], strides = [1, 1]} : vector<8x128xf32> to vector<8x32xf32>
      %137 = arith.negf %136 : vector<8x32xf32>
      %138 = math.exp %137 : vector<8x32xf32>
      %cst_101 = arith.constant 1.000000e+00 : f32
      %139 = vector.broadcast %cst_101 : f32 to vector<8x32xf32>
      %140 = arith.addf %139, %138 : vector<8x32xf32>
      %141 = arith.divf %139, %140 : vector<8x32xf32>
      %142 = vector.extract_strided_slice %104 {offsets = [0, 64], sizes = [8, 32], strides = [1, 1]} : vector<8x128xf32> to vector<8x32xf32>
      %143 = math.tanh %142 : vector<8x32xf32>
      %144 = vector.extract_strided_slice %104 {offsets = [0, 96], sizes = [8, 32], strides = [1, 1]} : vector<8x128xf32> to vector<8x32xf32>
      %145 = arith.negf %144 : vector<8x32xf32>
      %146 = math.exp %145 : vector<8x32xf32>
      %cst_102 = arith.constant 1.000000e+00 : f32
      %147 = vector.broadcast %cst_102 : f32 to vector<8x32xf32>
      %148 = arith.addf %147, %146 : vector<8x32xf32>
      %149 = arith.divf %147, %148 : vector<8x32xf32>
      %150 = arith.mulf %141, %arg23 : vector<8x32xf32>
      %151 = arith.mulf %135, %143 : vector<8x32xf32>
      %152 = arith.addf %150, %151 : vector<8x32xf32>
      %153 = math.tanh %152 : vector<8x32xf32>
      %154 = arith.mulf %149, %153 : vector<8x32xf32>
      %155 = arith.index_cast %arg21 : i32 to index
      %c0_103 = arith.constant 0 : index
      %c0_104 = arith.constant 0 : index
      %156 = vector.load %arg20[%155, %c0_103, %c0_104] : memref<7x8x32xf32, #tpu.memory_space<vmem>>, vector<1x8x32xf32>
      %157 = vector.shape_cast %156 : vector<1x8x32xf32> to vector<8x32xf32>
      %158 = vector.shape_cast %129 : vector<8x32xf32> to vector<1x8x32xf32>
      tpu.vector_store %arg20[%155, %c0_103, %c0_104], %158 {strides = array<i32>} : memref<7x8x32xf32, #tpu.memory_space<vmem>>, vector<1x8x32xf32>,
      %159 = arith.index_cast %arg21 : i32 to index
      %c0_105 = arith.constant 0 : index
      %c0_106 = arith.constant 0 : index
      %160 = vector.load %arg19[%159, %c0_105, %c0_106] : memref<7x8x32xf32, #tpu.memory_space<vmem>>, vector<1x8x32xf32>
      %161 = vector.shape_cast %160 : vector<1x8x32xf32> to vector<8x32xf32>
      %162 = vector.shape_cast %154 : vector<8x32xf32> to vector<1x8x32xf32>
      tpu.vector_store %arg19[%159, %c0_105, %c0_106], %162 {strides = array<i32>} : memref<7x8x32xf32, #tpu.memory_space<vmem>>, vector<1x8x32xf32>,
      scf.yield %154, %152, %129, %127 : vector<8x32xf32>, vector<8x32xf32>, vector<8x32xf32>, vector<8x32xf32>
    }
    %c7_i32_83 = arith.constant 7 : i32
    return
  }
}

</mosaic_0001>

<bundles_post_ra>
// kernel: dual_decoder_forward.4
= control target key start
LH: loop header
LB: loop body
LE: loop exit
PB: predicated region body
PF: predicated region fallthrough
CT: control target
= control target key end

     0   :  { %v473_v3 = vmov 0.0|0.0   ;;  %vm474_vm0 = vmmov 0   ;;  %v475_v6 = vmov 0.0   ;;  %s621_s0 = inlined_call_operand.vmem [shape: f32[56,32], index: 0, kind: input, shape index: {}]   ;;  %s622_s1 = inlined_call_operand.vmem [shape: f32[32,32], index: 1, kind: input, shape index: {}]   ;;  %s623_s2 = inlined_call_operand.vmem [shape: f32[1,32], index: 2, kind: input, shape index: {}]   ;;  %s624_s3 = inlined_call_operand.vmem [shape: f32[32,128], index: 3, kind: input, shape index: {}]   ;;  %s625_s4 = inlined_call_operand.vmem [shape: f32[1,128], index: 4, kind: input, shape index: {}]   ;;  %s626_s5 = inlined_call_operand.hbm [shape: f32[56,128], index: 5, kind: output, shape index: {}]  }
   0x1   :  { %v32_v0 = vld [vmem:[%s622_s1] sm:$0xff]  ;;  %v33_v1 = vld [vmem:[%s622_s1 + $0x8] sm:$0xff]  ;;  %v34_v2 = vld [vmem:[%s622_s1 + $0x10] sm:$0xff]  ;;  %431 = vmatprep.subr.bf16.mxu0 %v473_v3  ;;  %381 = vmatprep.mubr.msk.f32.mxu0 %vm474_vm0, %v475_v6 }
   0x2   :  { %v432_v4 = vpack.c.bf16 %v33_v1, %v32_v0  ;;  %v35_v5 = vld [vmem:[%s622_s1 + $0x18] sm:$0xff]  ;;  %437 = vmatprep.subr.bf16.mxu1 %v473_v3  ;;  %410 = vmatprep.mubr.msk.f32.mxu1 %vm474_vm0, %v475_v6 }
   0x3   :  { %v435_v7 = vpack.c.bf16 %v35_v5, %v34_v2 }
   0x4   :  { %433 = vmatpush3.bf16.msra.mxu0 %v432_v4 }
   0x5   :  { %434 = vmatprep.subr.bf16.mxu0 %v473_v3 }
   0x6   :  { %10 = vsyncpa [#allocation4], 0  ;;  %v25_v8 = vld [vmem:[%s621_s0] sm:$0xff]  ;;  %vm43_vm1 = vcmask 261120   ;;  %v26_v9 = vld [vmem:[%s621_s0 + $0x8] sm:$0xff] }
   0x7   :  { %v27_v10 = vld [vmem:[%s621_s0 + $0x10] sm:$0xff]  ;;  %v28_v11 = vld [vmem:[%s621_s0 + $0x18] sm:$0xff]  ;;  %v29_v12 = vld [vmem:[%s621_s0 + $0x20] sm:$0xff] }
   0x8   :  { %436 = vmatpush3.bf16.msra.mxu0 %v435_v7  ;;  %v30_v13 = vld [vmem:[%s621_s0 + $0x28] sm:$0xff]  ;;  %v31_v14 = vld [vmem:[%s621_s0 + $0x30] sm:$0xff]  ;;  %v179_v15 = vld [vmem:[%s624_s3] sm:$0xff] }
   0x9   :  { %v180_v16 = vld [vmem:[%s624_s3 + $0x8] sm:$0xff]  ;;  %v181_v18 = vld [vmem:[%s624_s3 + $0x10] sm:$0xff]  ;;  %v182_v19 = vld [vmem:[%s624_s3 + $0x18] sm:$0xff] }
   0xa   :  { %v438_v17 = vpack.c.bf16 %v180_v16, %v179_v15  ;;  %v441_v20 = vpack.c.bf16 %v182_v19, %v181_v18  ;;  %v335_v21 = vld [vmem:[%s623_s2] ss:$0 sm:$0xff] }
   0xb   :  { %382 = vmatmul.mubr.msk.f32.vlgmr.msra.gmra.mrb[0].mxu0 %vm43_vm1, %v25_v8  ;;  %v343_v50 = vld [vmem:[%s625_s4] ss:$0 sm:$0xff]  ;;  %s476_s4 = smov [#allocation3]  }
   0xc   :  { %384 = vmatprep.mubr.msk.f32.mxu0 %vm474_vm0, %v475_v6  ;;  %439 = vmatpush3.bf16.msra.mxu1 %v438_v17  ;;  %s324_s23 = sshll.u32 %s476_s4, 4  ;;  %s325_s23 = int_to_ptr.vmem [resolvable:$true] %s324_s23 }
   0xd   :  { %440 = vmatprep.subr.bf16.mxu1 %v473_v3  ;;  %s449_s24 = scalar_lea.vmem %s325_s23, 896  ;;  %p454_p1 = scmp.lt.s32.totalorder %s325_s23, %s325_s23 }
   0xe   :  { %p450_p0 = scmp.ne.s32.totalorder %s325_s23, %s449_s24  ;;  %p455_p2 = scmp.lt.s32.totalorder %s449_s24, %s449_s24 }
   0xf   :  { %385 = vmatmul.mubr.msk.f32.gmra.mrb[2].mxu0 %vm43_vm1, %v26_v9 }
  0x10   :  { %387 = vmatprep.mubr.msk.f32.mxu0 %vm474_vm0, %v475_v6  ;;  %442 = vmatpush3.bf16.msra.mxu1 %v441_v20  ;;  %p456_p3 = por %p455_p2, %p454_p1 }
  0x12   :  { %p457_p4 = pnand %p456_p3, %p450_p0 }
  0x13   :  { %388 = vmatmul.mubr.msk.f32.gmra.mrb[4].mxu0 %vm43_vm1, %v27_v10 }
  0x14   :  { %390 = vmatprep.mubr.msk.f32.mxu0 %vm474_vm0, %v475_v6 }
  0x17   :  { %391 = vmatmul.mubr.msk.f32.gmra.mrb[6].mxu0 %vm43_vm1, %v28_v11 }
  0x18   :  { %393 = vmatprep.mubr.msk.f32.mxu0 %vm474_vm0, %v475_v6 }
  0x1b   :  { %394 = vmatmul.mubr.msk.f32.gmra.mrb[8].mxu0 %vm43_vm1, %v29_v12 }
  0x1c   :  { %396 = vmatprep.mubr.msk.f32.mxu0 %vm474_vm0, %v475_v6 }
  0x1f   :  { %397 = vmatmul.mubr.msk.f32.gmra.mrb[10].mxu0 %vm43_vm1, %v30_v13 }
  0x20   :  { %399 = vmatprep.mubr.msk.f32.mxu0 %vm474_vm0, %v475_v6 }
  0x23   :  { %400 = vmatmul.mubr.msk.f32.gmra.mrb[12].mxu0 %vm43_vm1, %v31_v14 }
  0xde   :  { %v131_v22 = vpop.f32.mrb[0].mxu0 }
  0xdf   :  { %v132_v23 = vadd.f32 %v335_v21, %v131_v22  ;;  %v383_v24 = vpop.f32.mrb[1].mxu0 }
  0xe1   :  { %165 = vst.msk [vmem:[#allocation2] sm:$0xff] %vm43_vm1, %v132_v23 }
  0xe2   :  { %v136_v25 = vpop.f32.mrb[2].mxu0 }
  0xe3   :  { %v137_v26 = vadd.f32 %v335_v21, %v136_v25  ;;  %v386_v27 = vpop.f32.mrb[3].mxu0 }
  0xe5   :  { %166 = vst.msk [vmem:[#allocation2 + $0x8] sm:$0xff] %vm43_vm1, %v137_v26 }
  0xe6   :  { %v141_v28 = vpop.f32.mrb[4].mxu0 }
  0xe7   :  { %v142_v29 = vadd.f32 %v335_v21, %v141_v28  ;;  %v389_v30 = vpop.f32.mrb[5].mxu0 }
  0xe8   :  { %v172_v31 = vld [vmem:[#allocation2] sm:$0xff] }
  0xe9   :  { %167 = vst.msk [vmem:[#allocation2 + $0x10] sm:$0xff] %vm43_vm1, %v142_v29  ;;  %411 = vmatmul.mubr.msk.f32.vlgmr.msra.gmra.mrb[0].mxu1 %vm43_vm1, %v172_v31 }
  0xea   :  { %v146_v32 = vpop.f32.mrb[6].mxu0  ;;  %413 = vmatprep.mubr.msk.f32.mxu1 %vm474_vm0, %v475_v6 }
  0xeb   :  { %v147_v33 = vadd.f32 %v335_v21, %v146_v32  ;;  %v392_v34 = vpop.f32.mrb[7].mxu0 }
  0xec   :  { %v173_v35 = vld [vmem:[#allocation2 + $0x8] sm:$0xff] }
  0xed   :  { %168 = vst.msk [vmem:[#allocation2 + $0x18] sm:$0xff] %vm43_vm1, %v147_v33  ;;  %414 = vmatmul.mubr.msk.f32.gmra.mrb[2].mxu1 %vm43_vm1, %v173_v35 }
  0xee   :  { %v151_v36 = vpop.f32.mrb[8].mxu0  ;;  %416 = vmatprep.mubr.msk.f32.mxu1 %vm474_vm0, %v475_v6 }
  0xef   :  { %v152_v37 = vadd.f32 %v335_v21, %v151_v36  ;;  %v395_v38 = vpop.f32.mrb[9].mxu0 }
  0xf0   :  { %v174_v39 = vld [vmem:[#allocation2 + $0x10] sm:$0xff] }
  0xf1   :  { %169 = vst.msk [vmem:[#allocation2 + $0x20] sm:$0xff] %vm43_vm1, %v152_v37  ;;  %417 = vmatmul.mubr.msk.f32.gmra.mrb[4].mxu1 %vm43_vm1, %v174_v39 }
  0xf2   :  { %v156_v40 = vpop.f32.mrb[10].mxu0  ;;  %419 = vmatprep.mubr.msk.f32.mxu1 %vm474_vm0, %v475_v6 }
  0xf3   :  { %v157_v41 = vadd.f32 %v335_v21, %v156_v40  ;;  %v398_v42 = vpop.f32.mrb[11].mxu0 }
  0xf4   :  { %v175_v43 = vld [vmem:[#allocation2 + $0x18] sm:$0xff] }
  0xf5   :  { %170 = vst.msk [vmem:[#allocation2 + $0x28] sm:$0xff] %vm43_vm1, %v157_v41  ;;  %420 = vmatmul.mubr.msk.f32.gmra.mrb[6].mxu1 %vm43_vm1, %v175_v43 }
  0xf6   :  { %v161_v44 = vpop.f32.mrb[12].mxu0  ;;  %422 = vmatprep.mubr.msk.f32.mxu1 %vm474_vm0, %v475_v6 }
  0xf7   :  { %v162_v45 = vadd.f32 %v335_v21, %v161_v44  ;;  %v401_v46 = vpop.f32.mrb[13].mxu0 }
  0xf8   :  { %v176_v47 = vld [vmem:[#allocation2 + $0x20] sm:$0xff] }
  0xf9   :  { %171 = vst.msk [vmem:[#allocation2 + $0x30] sm:$0xff] %vm43_vm1, %v162_v45  ;;  %423 = vmatmul.mubr.msk.f32.gmra.mrb[8].mxu1 %vm43_vm1, %v176_v47 }
  0xfa   :  { %425 = vmatprep.mubr.msk.f32.mxu1 %vm474_vm0, %v475_v6 }
  0xfc   :  { %v177_v48 = vld [vmem:[#allocation2 + $0x28] sm:$0xff] }
  0xfd   :  { %426 = vmatmul.mubr.msk.f32.gmra.mrb[10].mxu1 %vm43_vm1, %v177_v48 }
  0xfe   :  { %428 = vmatprep.mubr.msk.f32.mxu1 %vm474_vm0, %v475_v6 }
 0x100   :  { %v178_v49 = vld [vmem:[#allocation2 + $0x30] sm:$0xff] }
 0x101   :  { %429 = vmatmul.mubr.msk.f32.gmra.mrb[12].mxu1 %vm43_vm1, %v178_v49 }
 0x1bc   :  { %v278_v51 = vpop.f32.mrb[0].mxu1 }
 0x1bd   :  { %v279_v52 = vadd.f32 %v343_v50, %v278_v51  ;;  %v412_v53 = vpop.f32.mrb[1].mxu1 }
 0x1bf   :  { %312 = vst [vmem:[#allocation3] sm:$0xff] %v279_v52 }
 0x1c0   :  { %v283_v54 = vpop.f32.mrb[2].mxu1 }
 0x1c1   :  { %v284_v55 = vadd.f32 %v343_v50, %v283_v54  ;;  %v415_v56 = vpop.f32.mrb[3].mxu1 }
 0x1c3   :  { %313 = vst [vmem:[#allocation3 + $0x8] sm:$0xff] %v284_v55 }
 0x1c4   :  { %v288_v57 = vpop.f32.mrb[4].mxu1 }
 0x1c5   :  { %v289_v58 = vadd.f32 %v343_v50, %v288_v57  ;;  %v418_v59 = vpop.f32.mrb[5].mxu1 }
 0x1c7   :  { %314 = vst [vmem:[#allocation3 + $0x10] sm:$0xff] %v289_v58 }
 0x1c8   :  { %v293_v60 = vpop.f32.mrb[6].mxu1 }
 0x1c9   :  { %v294_v61 = vadd.f32 %v343_v50, %v293_v60  ;;  %v421_v62 = vpop.f32.mrb[7].mxu1 }
 0x1cb   :  { %315 = vst [vmem:[#allocation3 + $0x18] sm:$0xff] %v294_v61 }
 0x1cc   :  { %v298_v63 = vpop.f32.mrb[8].mxu1 }
 0x1cd   :  { %v299_v0 = vadd.f32 %v343_v50, %v298_v63  ;;  %v424_v1 = vpop.f32.mrb[9].mxu1 }
 0x1cf   :  { %316 = vst [vmem:[#allocation3 + $0x20] sm:$0xff] %v299_v0 }
 0x1d0   :  { %v303_v2 = vpop.f32.mrb[10].mxu1 }
 0x1d1   :  { %v304_v3 = vadd.f32 %v343_v50, %v303_v2  ;;  %v427_v4 = vpop.f32.mrb[11].mxu1 }
 0x1d3   :  { %317 = vst [vmem:[#allocation3 + $0x28] sm:$0xff] %v304_v3 }
 0x1d4   :  { %v308_v5 = vpop.f32.mrb[12].mxu1 }
 0x1d5   :  { %v309_v6 = vadd.f32 %v343_v50, %v308_v5  ;;  %v430_v7 = vpop.f32.mrb[13].mxu1 }
 0x1d7   :  { %318 = vst [vmem:[#allocation3 + $0x30] sm:$0xff] %v309_v6 }
 0x1d8   :  { %460 = shalt.err (!%p457_p4)
}
 0x1d9   :  { %s461_s27 = scalar_lea.hbm %s626_s5, 896 }
 0x1da   :  { %p462_p5 = scmp.ne.s32.totalorder %s626_s5, %s461_s27  ;;  %p465_p6 = scmp.lt.u32.totalorder %s461_s27, %s626_s5 }
 0x1dc   :  { %p467_p7 = pnand %p465_p6, %p462_p5 }
 0x1de   :  { %470 = shalt.err (!%p467_p7)
}
 0x1df   :  { %s477_s6 = smov 128   ;;  %s478_s7 = smov 8  }
 0x1e0   :  { %330 = dma.vmem_to_hbm [thread:$0]  %s325_s23, 896, %s626_s5, [#allocation4], %s477_s6, %s477_s6, %s478_s7  }
 0x1e1   :  { %471 = dma.done.wait [#allocation4], 896  }
 0x1e2   :  { %472 = vsyncadd [#allocation4], 4294966400 }
 0x1e3   :  { %334 = vsyncpa [#allocation4], 1 }

// kernel: dual_decoder_forward.3
= control target key start
LH: loop header
LB: loop body
LE: loop exit
PB: predicated region body
PF: predicated region fallthrough
CT: control target
= control target key end

     0   :  { %v2442_v10 = vmov 0.0   ;;  %v2444_v11 = vmov 0.0   ;;  %s2446_s26 = smov 0   ;;  %s2942_s0 = inlined_call_operand.vmem [shape: f32[6,8,32], index: 0, kind: input, shape index: {}]   ;;  %s2943_s2 = inlined_call_operand.vmem [shape: f32[8,8,32], index: 2, kind: input, shape index: {}]   ;;  %s2944_s3 = inlined_call_operand.vmem [shape: f32[8,8,32], index: 3, kind: input, shape index: {}]   ;;  %s2945_s4 = inlined_call_operand.vmem [shape: f32[32,128], index: 4, kind: input, shape index: {}]   ;;  %s2946_s5 = inlined_call_operand.vmem [shape: f32[32,128], index: 5, kind: input, shape index: {}]   ;;  %s2947_s6 = inlined_call_operand.vmem [shape: f32[1,128], index: 6, kind: input, shape index: {}]   ;;  %s2948_s7 = inlined_call_operand.vmem [shape: f32[32,128], index: 7, kind: input, shape index: {}]   ;;  %s2949_s8 = inlined_call_operand.vmem [shape: f32[32,128], index: 8, kind: input, shape index: {}]   ;;  %s2950_s9 = inlined_call_operand.vmem [shape: f32[32,128], index: 9, kind: input, shape index: {}]   ;;  %s2951_s10 = inlined_call_operand.vmem [shape: f32[1,128], index: 10, kind: input, shape index: {}]   ;;  %s2952_s11 = inlined_call_operand.vmem [shape: f32[32,128], index: 11, kind: input, shape index: {}]   ;;  %s2953_s12 = inlined_call_operand.vmem [shape: f32[32,128], index: 12, kind: input, shape index: {}]   ;;  %s2954_s13 = inlined_call_operand.vmem [shape: f32[32,128], index: 13, kind: input, shape index: {}]   ;;  %s2955_s14 = inlined_call_operand.vmem [shape: f32[1,128], index: 14, kind: input, shape index: {}]   ;;  %s2956_s15 = inlined_call_operand.vmem [shape: f32[4,32,64], index: 15, kind: input, shape index: {}]   ;;  %s2957_s16 = inlined_call_operand.vmem [shape: f32[4,1,64], index: 16, kind: input, shape index: {}]   ;;  %s2958_s17 = inlined_call_operand.vmem [shape: f32[4,64,32], index: 17, kind: input, shape index: {}]   ;;  %s2959_s18 = inlined_call_operand.vmem [shape: f32[4,1,32], index: 18, kind: input, shape index: {}]   ;;  %s2960_s19 = inlined_call_operand.vmem [shape: f32[7,8,32], index: 19, kind: output, shape index: {0}]   ;;  %s2961_s20 = inlined_call_operand.vmem [shape: f32[7,8,32], index: 20, kind: output, shape index: {1}]   ;;  %s2962_s1 = inlined_call_operand.vmem [shape: s32[8,1], index: 1, kind: input, shape index: {}]  }
   0x1   :  { %2965 = sst [smem:[#allocation2_spill]] %s2942_s0  ;;  %v2435_v8 = vld [vmem:[%s2947_s6] ss:$0 sm:$0xff] }
   0x2   :  { %2966 = sst [smem:[#allocation3_spill]] %s2943_s2  ;;  %v2440_v9 = vld [vmem:[%s2962_s1] sm:$0xff] }
   0x3   :  { %2967 = sst [smem:[#allocation4_spill]] %s2944_s3 }
   0x4   :  { %2968 = sst [smem:[#allocation5_spill]] %s2945_s4 }
   0x5   :  { %2969 = sst [smem:[#allocation6_spill]] %s2946_s5  ;;  %s2970_s23 = sld [smem:[#allocation5_spill]] }
   0x6   :  { %s2971_s29 = sld [smem:[#allocation6_spill]] }
   0xb   :  { %v2395_v0 = vld [vmem:[%s2970_s23] sm:$0xff]  ;;  %v2400_v1 = vld [vmem:[%s2970_s23 + $0x8] sm:$0xff]  ;;  %v2405_v2 = vld [vmem:[%s2970_s23 + $0x10] sm:$0xff] }
   0xc   :  { %v2410_v3 = vld [vmem:[%s2970_s23 + $0x18] sm:$0xff]  ;;  %v2415_v4 = vld [vmem:[%s2971_s29] sm:$0xff]  ;;  %v2420_v5 = vld [vmem:[%s2971_s29 + $0x8] sm:$0xff] }
   0xd   :  { %v2425_v6 = vld [vmem:[%s2971_s29 + $0x10] sm:$0xff]  ;;  %v2430_v7 = vld [vmem:[%s2971_s29 + $0x18] sm:$0xff] }
   0xe LB: > { %v1986_v12 = vpack.c.bf16 %v2400_v1, %v2395_v0  ;;  %v1980_v13 = vpack.c.bf16 %v2420_v5, %v2415_v4  ;;  %v2270_v14 = vmov 0.0|0.0   ;;  %s2271_s1 = smov 32   ;;  %v1989_v15 = vpack.c.bf16 %v2410_v3, %v2405_v2  ;;  %s1599_s6 = sshll.u32 %s2248_s26, 3  ;;  %s2248_s26 = sphi %s2446_s26, %s79_s26   ;;  %v2244_v11 = vphi %v2444_v11, %v2974_v11   ;;  %v2240_v10 = vphi %v2442_v10, %v2973_v10  }
   0xf   : > { %1985 = vmatprep.subr.bf16.mxu1 %v2270_v14  ;;  %1979 = vmatprep.subr.bf16.mxu0 %v2270_v14  ;;  %v1983_v16 = vpack.c.bf16 %v2430_v7, %v2425_v6  ;;  %s2972_s5 = sld [smem:[#allocation2_spill]]  ;;  %vm2272_vm0 = vmmov 0   ;;  %v2273_v17 = vmov 0.0   ;;  %vm88_vm1 = vcmask 261120   ;;  %s2275_s30 = smov 64  }
  0x10   : > { %86 = vrot.lane.b32.xlu0 %v2244_v11, %s2271_s1  ;;  %1987 = vmatpush3.bf16.msra.mxu1 %v1986_v12  ;;  %v2274_v26 = vmov 0   ;;  %v265_v31 = vstv %s2248_s26  ;;  %s79_s26 = sadd.s32 1, %s2248_s26  }
  0x11   : > { %1981 = vmatpush3.bf16.msra.mxu0 %v1980_v13  ;;  %1988 = vmatprep.subr.bf16.mxu1 %v2270_v14  ;;  %vm266_vm2 = vcmp.lt.s32.totalorder %v265_v31, %v2440_v9  ;;  %p76_p0 = scmp.ge.s32.totalorder %s79_s26, 6  }
  0x12   : > { %1982 = vmatprep.subr.bf16.mxu0 %v2270_v14  ;;  %1790 = vmatprep.mubr.msk.f32.mxu1 %vm2272_vm0, %v2273_v17  ;;  %v267_v35 = vsel %vm266_vm2, 1, %v2274_v26  ;;  %v274_v45 = vld [vmem:[%s2956_s15] sm:$0xff] (%p76_p0)  ;;  %v275_v46 = vld [vmem:[%s2956_s15 + $0x8] sm:$0xff] (%p76_p0)  ;;  %v276_v47 = vld [vmem:[%s2956_s15 + $0x10] sm:$0xff] (%p76_p0)  ;;  %s2276_s3 = smov (%p76_p0), 32   ;;  %v2277_v48 = vmov (%p76_p0), 0.0|0.0  }
  0x13   : > { %1779 = vmatprep.mubr.msk.f32.mxu0 %vm2272_vm0, %v2273_v17  ;;  %2180 = vset.pattern.permute.xlu1 %v2274_v26  ;;  %v1992_v49 = vpack.c.bf16 (%p76_p0), %v275_v46, %v274_v45  ;;  %v277_v50 = vld [vmem:[%s2956_s15 + $0x18] sm:$0xff] (%p76_p0)  ;;  %v1608_v51 = vld [vmem:[%s2956_s15 + $0x20] sm:$0xff] (%p76_p0)  ;;  %v1609_v52 = vld [vmem:[%s2956_s15 + $0x28] sm:$0xff] (%p76_p0)  ;;  %vm2278_vm4 = vmmov (%p76_p0), 0   ;;  %v2279_v54 = vmov (%p76_p0), 0.0   ;;  %s2280_s0 = smov (%p76_p0), 96  }
  0x14   : > { %1990 = vmatpush3.bf16.msra.mxu1 %v1989_v15  ;;  %2181 = vset.pattern.permute.xlu0 %v2274_v26  ;;  %v2010_v53 = vpack.c.bf16 (%p76_p0), %v1609_v52, %v1608_v51  ;;  %v1610_v55 = vld [vmem:[%s2956_s15 + $0x30] sm:$0xff] (%p76_p0)  ;;  %v1611_v56 = vld [vmem:[%s2956_s15 + $0x38] sm:$0xff] (%p76_p0)  ;;  %v1995_v57 = vpack.c.bf16 (%p76_p0), %v277_v50, %v276_v47  ;;  %v362_v59 = vld [vmem:[%s2958_s17] sm:$0xff] (%p76_p0)  ;;  %vm377_vm5 = vcmask (%p76_p0), 523264  }
  0x15   : > { %s83_s29 = scalar_lea.vmem %s2972_s5, %s1599_s6  ;;  %1984 = vmatpush3.bf16.msra.mxu0 %v1983_v16  ;;  %1991 = vmatprep.subr.bf16.mxu1 (%p76_p0), %v2277_v48  ;;  %v2013_v58 = vpack.c.bf16 (%p76_p0), %v1611_v56, %v1610_v55  ;;  %v363_v60 = vld [vmem:[%s2958_s17 + $0x8] sm:$0xff] (%p76_p0)  ;;  %v364_v62 = vld [vmem:[%s2958_s17 + $0x10] sm:$0xff] (%p76_p0)  ;;  %v365_v63 = vld [vmem:[%s2958_s17 + $0x18] sm:$0xff] (%p76_p0) }
  0x16   : > { %v84_v18 = vld [vmem:[%s83_s29] sm:$0xff]  ;;  %2009 = vmatprep.subr.bf16.mxu0 (%p76_p0), %v2277_v48  ;;  %v1998_v61 = vpack.c.bf16 (%p76_p0), %v363_v60, %v362_v59  ;;  %v1616_v1 = vld [vmem:[%s2958_s17 + $0x48] sm:$0xff] (%p76_p0)  ;;  %v2001_v3 = vpack.c.bf16 (%p76_p0), %v365_v63, %v364_v62  ;;  %v1617_v7 = vld [vmem:[%s2958_s17 + $0x50] sm:$0xff] (%p76_p0) }
  0x17   : > { %1791 = vmatmul.mubr.msk.f32.vlgmr.msra.gmra.mrb[0].mxu1 %vm88_vm1, %v84_v18  ;;  %v1615_v0 = vld [vmem:[%s2958_s17 + $0x40] sm:$0xff] (%p76_p0)  ;;  %v367_v6 = vld [vmem:[%s2958_s17 + $0x28] sm:$0xff] (%p76_p0)  ;;  %v368_v12 = vld [vmem:[%s2958_s17 + $0x30] sm:$0xff] (%p76_p0) }
  0x18   :  { %1801 = vmatprep.mubr.msk.f32.mxu1 (%p76_p0), %vm2278_vm4, %v2279_v54  ;;  %1993 = vmatpush3.bf16.msra.mxu1 (%p76_p0), %v1992_v49  ;;  %v2016_v4 = vpack.c.bf16 (%p76_p0), %v1616_v1, %v1615_v0  ;;  %v366_v5 = vld [vmem:[%s2958_s17 + $0x20] sm:$0xff] (%p76_p0)  ;;  %v369_v13 = vld [vmem:[%s2958_s17 + $0x38] sm:$0xff] (%p76_p0)  ;;  %v1620_v16 = vld [vmem:[%s2958_s17 + $0x68] sm:$0xff] (%p76_p0) }
  0x19   :  { %1994 = vmatprep.subr.bf16.mxu1 (%p76_p0), %v2277_v48  ;;  %v1619_v14 = vld [vmem:[%s2958_s17 + $0x60] sm:$0xff] (%p76_p0)  ;;  %v2007_v15 = vpack.c.bf16 (%p76_p0), %v369_v13, %v368_v12  ;;  %v1621_v18 = vld [vmem:[%s2958_s17 + $0x70] sm:$0xff] (%p76_p0)  ;;  %v1629_v31 = vld [vmem:[%s2956_s15 + $0x58] sm:$0xff] (%p76_p0) }
  0x1a   :  { %v2022_v17 = vpack.c.bf16 (%p76_p0), %v1620_v16, %v1619_v14  ;;  %v1635_v46 = vld [vmem:[%s2958_s17 + $0x90] sm:$0xff] (%p76_p0)  ;;  %v1636_v47 = vld [vmem:[%s2958_s17 + $0x98] sm:$0xff] (%p76_p0)  ;;  %v1651_v49 = vld [vmem:[%s2958_s17 + $0xc0] sm:$0xff] (%p76_p0) }
  0x1b   :  { %v2037_v50 = vpack.c.bf16 (%p76_p0), %v1636_v47, %v1635_v46  ;;  %v1652_v51 = vld [vmem:[%s2958_s17 + $0xc8] sm:$0xff] (%p76_p0)  ;;  %v1653_v55 = vld [vmem:[%s2958_s17 + $0xd0] sm:$0xff] (%p76_p0)  ;;  %v1640_v60 = vld [vmem:[%s2958_s17 + $0xb8] sm:$0xff] (%p76_p0) }
  0x1c   :  { %1996 = vmatpush3.bf16.msra.mxu1 (%p76_p0), %v1995_v57  ;;  %v2052_v52 = vpack.c.bf16 (%p76_p0), %v1652_v51, %v1651_v49  ;;  %v1654_v57 = vld [vmem:[%s2958_s17 + $0xd8] sm:$0xff] (%p76_p0)  ;;  %v1639_v59 = vld [vmem:[%s2958_s17 + $0xb0] sm:$0xff] (%p76_p0)  ;;  %v1656_v63 = vld [vmem:[%s2958_s17 + $0xe8] sm:$0xff] (%p76_p0) }
  0x1d   :  { %1997 = vmatprep.subr.bf16.mxu1 (%p76_p0), %v2277_v48  ;;  %v2043_v62 = vpack.c.bf16 (%p76_p0), %v1640_v60, %v1639_v59  ;;  %v1657_v1 = vld [vmem:[%s2958_s17 + $0xf0] sm:$0xff] (%p76_p0)  ;;  %v2833_v46 = vld [vmem:[%s2955_s14] ss:$0 sm:$0xff] (%p76_p0)  ;;  %v1642_v47 = vld [vmem:[%s2959_s18 + $0x2] ss:$0 sm:$0xff] (%p76_p0) }
  0x82   : > { %v87_v19 = vpop.permute.xlu0 %86 }
  0x83   : > { %1780 = vmatmul.mubr.msk.f32.vlgmr.msra.gmra.mrb[0].mxu0 %vm88_vm1, %v87_v19  ;;  %v1622_v19 = vld [vmem:[%s2958_s17 + $0x78] sm:$0xff] (%p76_p0) }
  0x84   :  { %1831 = vmatprep.mubr.msk.f32.mxu0 (%p76_p0), %vm2278_vm4, %v2279_v54  ;;  %2011 = vmatpush3.bf16.msra.mxu0 (%p76_p0), %v2010_v53  ;;  %v1637_v53 = vld [vmem:[%s2958_s17 + $0xa0] sm:$0xff] (%p76_p0) }
  0x85   :  { %2012 = vmatprep.subr.bf16.mxu0 (%p76_p0), %v2277_v48 }
  0x88   :  { %2014 = vmatpush3.bf16.msra.mxu0 (%p76_p0), %v2013_v58  ;;  %v2055_v58 = vpack.c.bf16 (%p76_p0), %v1654_v57, %v1653_v55 }
  0x89   :  { %2015 = vmatprep.subr.bf16.mxu0 (%p76_p0), %v2277_v48 }
  0xea   : > { %v230_v20 = vpop.f32.mrb[0].mxu1 }
  0xeb   : > { %v1792_v21 = vpop.f32.mrb[1].mxu1 }
  0xec   :  { %v1604_v21 = vld [vmem:[%s2957_s16] ss:$0 sm:$0xff] (%p76_p0) }
 0x156   : > { %v157_v22 = vpop.f32.mrb[0].mxu0 }
 0x157   : > { %v231_v23 = vadd.f32 %v230_v20, %v157_v22  ;;  %v1781_v24 = vpop.f32.mrb[1].mxu0  ;;  %v2025_v20 = vpack.c.bf16 (%p76_p0), %v1622_v19, %v1621_v18  ;;  %v1626_v22 = vld [vmem:[%s2956_s15 + $0x40] sm:$0xff] (%p76_p0) }
 0x159   : > { %v240_v25 = vadd.f32 %v2435_v8, %v231_v23  ;;  %v1618_v8 = vld [vmem:[%s2958_s17 + $0x58] sm:$0xff] (%p76_p0)  ;;  %v1627_v23 = vld [vmem:[%s2956_s15 + $0x48] sm:$0xff] (%p76_p0) }
 0x15b   : > { %2182 = vtanh.f32 %v240_v25  ;;  %v1603_v28 = vmul.f32 -1.442695, %v240_v25 }
 0x15d   : > { %2184 = vpow2.f32 %v1603_v28  ;;  %v2028_v28 = vpack.c.bf16 (%p76_p0), %v1627_v23, %v1626_v22  ;;  %v2713_v22 = vld [vmem:[%s2948_s7 + $0x8] sm:$0xff] (%p76_p0)  ;;  %v2718_v23 = vld [vmem:[%s2948_s7 + $0x10] sm:$0xff] (%p76_p0) }
 0x165   : > { %v2183_v27 = vpop.eup %2182 }
 0x166   : > { %250 = vrot.lane.b32.xlu0 %v2183_v27, %s2275_s30  ;;  %v1613_v27 = vld [vmem:[%s2957_s16 + $0x1] ss:$0 sm:$0xff] (%p76_p0) }
 0x167   : > { %v2185_v29 = vpop.eup %2184 }
 0x168   : > { %v244_v30 = vadd.f32 1.0, %v2185_v29  ;;  %v1628_v29 = vld [vmem:[%s2956_s15 + $0x50] sm:$0xff] (%p76_p0) }
 0x16a   : > { %2186 = vrcp.f32 %v244_v30 }
 0x174   : > { %v2187_v32 = vpop.eup %2186 }
 0x175   : > { %v248_v36 = vmul.f32 %v2240_v10, %v2187_v32 }
 0x1d8   : > { %v251_v33 = vpop.permute.xlu0 %250 }
 0x1d9   : > { %v253_v34 = vmul.f32 %v2187_v32, %v251_v33  ;;  %v1645_v33 = vld [vmem:[%s2956_s15 + $0x68] sm:$0xff] (%p76_p0) }
 0x1db   : > { %255 = vrot.lane.b32.xlu1 %v253_v34, %s2271_s1 }
 0x1df   : > { %269 = vperm.xlu1 %2180, %v267_v35  }
 0x24d   : > { %v256_v37 = vpop.permute.xlu1 %255 }
 0x24e   : > { %v258_v38 = vadd.f32 %v256_v37, %v248_v36  ;;  %v2031_v37 = vpack.c.bf16 (%p76_p0), %v1629_v31, %v1628_v29  ;;  %v2748_v29 = vld [vmem:[%s2950_s9] sm:$0xff] (%p76_p0)  ;;  %v2758_v31 = vld [vmem:[%s2950_s9 + $0x10] sm:$0xff] (%p76_p0) }
 0x250   : > { %2188 = vtanh.f32 %v258_v38 }
 0x25a   : > { %v2189_v39 = vpop.eup %2188 }
 0x25b   : > { %261 = vrot.lane.b32.xlu0 %v2189_v39, %s2275_s30  ;;  %v1646_v39 = vld [vmem:[%s2956_s15 + $0x70] sm:$0xff] (%p76_p0) }
 0x25e   : > { %v270_v40 = vpop.permute.xlu1 %269 }
 0x25f   : > { %vm271_vm3 = vcmp.eq.s32.totalorder %v270_v40, 1 }
 0x260   : > { %v273_v41 = vsel %vm271_vm3, %v258_v38, %v2240_v10  }
 0x261   : > { %v2973_v10 = vmov %v273_v41 }
 0x262   :  { %v2004_v10 = vpack.c.bf16 (%p76_p0), %v367_v6, %v366_v5 }
 0x2cb   :  { %78 = sbr.rel (!%p76_p0) target bundleno = 14 (0xe), region = 136 }
 0x2cd   : > { %v262_v42 = vpop.permute.xlu0 %261 }
 0x2ce   : > { %v264_v43 = vmul.f32 %v2187_v32, %v262_v42  ;;  %v1644_v32 = vld [vmem:[%s2956_s15 + $0x60] sm:$0xff] (%p76_p0) }
 0x2cf   :  { %v2046_v38 = vpack.c.bf16 (%p76_p0), %v1645_v33, %v1644_v32  ;;  %v1633_v42 = vld [vmem:[%s2958_s17 + $0x80] sm:$0xff] (%p76_p0)  ;;  %v2763_v32 = vld [vmem:[%s2950_s9 + $0x18] sm:$0xff] (%p76_p0) }
 0x2d0   : > { %v272_v44 = vsel %vm271_vm3, %v264_v43, %v2244_v11   ;;  %v1634_v43 = vld [vmem:[%s2958_s17 + $0x88] sm:$0xff] (%p76_p0)  ;;  %v2768_v33 = vld [vmem:[%s2951_s10] ss:$0 sm:$0xff] (%p76_p0) }
 0x2d1   : > { %v2974_v11 = vmov %v272_v44  ;;  %286 = vrot.lane.b32.xlu0 (%p76_p0), %v272_v44, %s2276_s3  ;;  %v2034_v45 = vpack.c.bf16 (%p76_p0), %v1634_v43, %v1633_v42  ;;  %v2813_v42 = vld [vmem:[%s2954_s13] sm:$0xff] (%p76_p0)  ;;  %v2818_v43 = vld [vmem:[%s2954_s13 + $0x8] sm:$0xff] (%p76_p0) }
 0x2d2   :  { %v2019_v11 = vpack.c.bf16 %v1618_v8, %v1617_v7  ;;  %v1624_v8 = vld [vmem:[%s2959_s18 + $0x1] ss:$0 sm:$0xff] }
 0x2d5   :  { %465 = vrot.lane.b32.xlu0 %v273_v41, %s2280_s0  ;;  %v1647_v41 = vld [vmem:[%s2956_s15 + $0x78] sm:$0xff] }
 0x2d6   :  { %v2049_v44 = vpack.c.bf16 %v1647_v41, %v1646_v39  ;;  %v2798_v39 = vld [vmem:[%s2953_s12 + $0x8] sm:$0xff]  ;;  %v2808_v41 = vld [vmem:[%s2953_s12 + $0x18] sm:$0xff] }
 0x343   :  { %v2539_v2 = vpop.permute.xlu0 %286 }
 0x344   :  { %1802 = vmatmul.mubr.msk.f32.vlgmr.msra.gmra.mrb[0].mxu1 %vm88_vm1, %v2539_v2 }
 0x345   :  { %1999 = vmatpush3.bf16.msra.mxu1 %v1998_v61  ;;  %1820 = vmatprep.mubr.msk.f32.mxu1 %vm2278_vm4, %v2279_v54  ;;  %v1655_v61 = vld [vmem:[%s2958_s17 + $0xe0] sm:$0xff] }
 0x346   :  { %2000 = vmatprep.subr.bf16.mxu1 %v2277_v48  ;;  %v2058_v0 = vpack.c.bf16 %v1656_v63, %v1655_v61 }
 0x347   :  { %v2558_v9 = vpop.permute.xlu0 %465 }
 0x348   :  { %1832 = vmatmul.mubr.msk.f32.vlgmr.msra.gmra.mrb[0].mxu0 %vm88_vm1, %v2558_v9 }
 0x349   :  { %2002 = vmatpush3.bf16.msra.mxu1 %v2001_v3  ;;  %2017 = vmatpush3.bf16.msra.mxu0 %v2016_v4  ;;  %v1606_v4 = vld [vmem:[%s2959_s18] ss:$0 sm:$0xff] }
 0x34a   :  { %2003 = vmatprep.subr.bf16.mxu1 %v2277_v48  ;;  %2018 = vmatprep.subr.bf16.mxu0 %v2277_v48 }
 0x34b   :  { %1850 = vmatprep.mubr.msk.f32.mxu0 %vm2278_vm4, %v2279_v54 }
 0x34d   :  { %2005 = vmatpush3.bf16.msra.mxu1 %v2004_v10  ;;  %2020 = vmatpush3.bf16.msra.mxu0 %v2019_v11 }
 0x34e   :  { %2006 = vmatprep.subr.bf16.mxu1 %v2277_v48  ;;  %2021 = vmatprep.subr.bf16.mxu0 %v2277_v48 }
 0x351   :  { %2008 = vmatpush3.bf16.msra.mxu1 %v2007_v15  ;;  %2023 = vmatpush3.bf16.msra.mxu0 %v2022_v17  ;;  %v1649_v15 = vld [vmem:[%s2957_s16 + $0x3] ss:$0 sm:$0xff] }
 0x352   :  { %2027 = vmatprep.subr.bf16.mxu1 %v2277_v48  ;;  %2024 = vmatprep.subr.bf16.mxu0 %v2277_v48 }
 0x355   :  { %2026 = vmatpush3.bf16.msra.mxu0 %v2025_v20 }
 0x356   :  { %2045 = vmatprep.subr.bf16.mxu0 %v2277_v48 }
 0x417   :  { %v357_v24 = vpop.f32.mrb[0].mxu1 }
 0x418   :  { %v358_v25 = vadd.f32 %v1604_v21, %v357_v24  ;;  %v1803_v26 = vpop.f32.mrb[1].mxu1  ;;  %v2708_v21 = vld [vmem:[%s2948_s7] sm:$0xff]  ;;  %v2723_v24 = vld [vmem:[%s2948_s7 + $0x18] sm:$0xff] }
 0x419   :  { %v2733_v26 = vld [vmem:[%s2949_s8 + $0x8] sm:$0xff] }
 0x41a   :  { %v361_v30 = vmax.f32 %v358_v25, 0.0  ;;  %v2728_v25 = vld [vmem:[%s2949_s8] sm:$0xff] }
 0x41b   :  { %v535_v34 = vpop.f32.mrb[0].mxu0 }
 0x41c   :  { %v536_v35 = vadd.f32 %v1613_v27, %v535_v34  ;;  %1821 = vmatmul.mubr.msk.f32.vlgmr.msra.gmra.mrb[2].mxu1 %vm377_vm5, %v361_v30  ;;  %v1833_v36 = vpop.f32.mrb[1].mxu0  ;;  %v2738_v27 = vld [vmem:[%s2949_s8 + $0x10] sm:$0xff]  ;;  %v2753_v30 = vld [vmem:[%s2950_s9 + $0x8] sm:$0xff]  ;;  %v2773_v34 = vld [vmem:[%s2952_s11] sm:$0xff] }
 0x41d   :  { %2029 = vmatpush3.bf16.msra.mxu1 %v2028_v28  ;;  %1861 = vmatprep.mubr.msk.f32.mxu1 %vm2278_vm4, %v2279_v54  ;;  %v2743_v28 = vld [vmem:[%s2949_s8 + $0x18] sm:$0xff]  ;;  %v2783_v36 = vld [vmem:[%s2952_s11 + $0x10] sm:$0xff] }
 0x41e   :  { %v539_v40 = vmax.f32 %v536_v35, 0.0  ;;  %2030 = vmatprep.subr.bf16.mxu1 %v2277_v48  ;;  %v2778_v35 = vld [vmem:[%s2952_s11 + $0x8] sm:$0xff] }
 0x420   :  { %1851 = vmatmul.mubr.msk.f32.vlgmr.msra.gmra.mrb[2].mxu0 %vm377_vm5, %v539_v40  ;;  %v2803_v40 = vld [vmem:[%s2953_s12 + $0x10] sm:$0xff] }
 0x421   :  { %2032 = vmatpush3.bf16.msra.mxu1 %v2031_v37  ;;  %2047 = vmatpush3.bf16.msra.mxu0 %v2046_v38  ;;  %v2788_v37 = vld [vmem:[%s2952_s11 + $0x18] sm:$0xff]  ;;  %v2793_v38 = vld [vmem:[%s2953_s12] sm:$0xff] }
 0x422   :  { %2048 = vmatprep.subr.bf16.mxu0 %v2277_v48  ;;  %1891 = vmatprep.mubr.msk.f32.mxu0 %vm2278_vm4, %v2279_v54 }
 0x423   :  { %2033 = vmatprep.subr.bf16.mxu1 %v2277_v48 }
 0x424   :  { %1862 = vmatmul.mubr.msk.f32.vlgmr.msra.gmra.mrb[4].mxu1 %vm88_vm1, %v2539_v2  ;;  %v1658_v2 = vld [vmem:[%s2958_s17 + $0xf8] sm:$0xff] }
 0x425   :  { %2050 = vmatpush3.bf16.msra.mxu0 %v2049_v44  ;;  %2035 = vmatpush3.bf16.msra.mxu1 %v2034_v45  ;;  %v2061_v3 = vpack.c.bf16 %v1658_v2, %v1657_v1  ;;  %v2823_v44 = vld [vmem:[%s2954_s13 + $0x10] sm:$0xff]  ;;  %v2828_v45 = vld [vmem:[%s2954_s13 + $0x18] sm:$0xff]  ;;  %s2849_s13 = smov 0  }
 0x426   :  { %2036 = vmatprep.subr.bf16.mxu1 %v2277_v48  ;;  %2051 = vmatprep.subr.bf16.mxu0 %v2277_v48 }
 0x427   :  { %1880 = vmatprep.mubr.msk.f32.mxu1 %vm2278_vm4, %v2279_v54 }
 0x428   :  { %1892 = vmatmul.mubr.msk.f32.vlgmr.msra.gmra.mrb[4].mxu0 %vm88_vm1, %v2558_v9 }
 0x429   :  { %1910 = vmatprep.mubr.msk.f32.mxu0 %vm2278_vm4, %v2279_v54  ;;  %2038 = vmatpush3.bf16.msra.mxu1 %v2037_v50  ;;  %v1638_v54 = vld [vmem:[%s2958_s17 + $0xa8] sm:$0xff] }
 0x42a   :  { %2053 = vmatpush3.bf16.msra.mxu0 %v2052_v52  ;;  %2039 = vmatprep.subr.bf16.mxu1 %v2277_v48  ;;  %v2040_v56 = vpack.c.bf16 %v1638_v54, %v1637_v53  ;;  %v1660_v52 = vld [vmem:[%s2959_s18 + $0x3] ss:$0 sm:$0xff] }
 0x42b   :  { %2054 = vmatprep.subr.bf16.mxu0 %v2277_v48 }
 0x42d   :  { %2041 = vmatpush3.bf16.msra.mxu1 %v2040_v56 }
 0x42e   :  { %2056 = vmatpush3.bf16.msra.mxu0 %v2055_v58  ;;  %2042 = vmatprep.subr.bf16.mxu1 %v2277_v48 }
 0x42f   :  { %2057 = vmatprep.subr.bf16.mxu0 %v2277_v48 }
 0x431   :  { %2044 = vmatpush3.bf16.msra.mxu1 %v2043_v62 }
 0x432   :  { %2059 = vmatpush3.bf16.msra.mxu0 %v2058_v0 }
 0x433   :  { %2060 = vmatprep.subr.bf16.mxu0 %v2277_v48  ;;  %v1631_v48 = vld [vmem:[%s2957_s16 + $0x2] ss:$0 sm:$0xff] }
 0x436   :  { %2062 = vmatpush3.bf16.msra.mxu0 %v2061_v3 }
 0x4ef   :  { %v447_v5 = vpop.f32.mrb[2].mxu1 }
 0x4f0   :  { %v448_v6 = vadd.f32 %v1606_v4, %v447_v5   ;;  %v1822_v7 = vpop.f32.mrb[3].mxu1 }
 0x4f3   :  { %v626_v9 = vpop.f32.mrb[2].mxu0 }
 0x4f4   :  { %v627_v10 = vadd.f32 %v1624_v8, %v626_v9   ;;  %v1852_v11 = vpop.f32.mrb[3].mxu0 }
 0x4f7   :  { %v709_v12 = vpop.f32.mrb[4].mxu1 }
 0x4f8   :  { %v710_v13 = vadd.f32 %v1631_v48, %v709_v12  ;;  %v1863_v14 = vpop.f32.mrb[5].mxu1 }
 0x4fa   :  { %v713_v16 = vmax.f32 %v710_v13, 0.0 }
 0x4fb   :  { %v883_v17 = vpop.f32.mrb[4].mxu0 }
 0x4fc   :  { %v884_v18 = vadd.f32 %v1649_v15, %v883_v17  ;;  %1881 = vmatmul.mubr.msk.f32.vlgmr.msra.gmra.mrb[6].mxu1 %vm377_vm5, %v713_v16  ;;  %v1893_v19 = vpop.f32.mrb[5].mxu0 }
 0x4fe   :  { %v887_v20 = vmax.f32 %v884_v18, 0.0 }
 0x500   :  { %1911 = vmatmul.mubr.msk.f32.vlgmr.msra.gmra.mrb[6].mxu0 %vm377_vm5, %v887_v20 }
 0x5cf   :  { %v800_v49 = vpop.f32.mrb[6].mxu1 }
 0x5d0   :  { %v801_v50 = vadd.f32 %v1642_v47, %v800_v49   ;;  %v1882_v51 = vpop.f32.mrb[7].mxu1 }
 0x5d3   :  { %v974_v53 = vpop.f32.mrb[6].mxu0 }
 0x5d4   :  { %v975_v54 = vadd.f32 %v1660_v52, %v974_v53   ;;  %v1912_v55 = vpop.f32.mrb[7].mxu0 }
 0x5d5 LB: > { %v2064_v56 = vpack.c.bf16 %v2733_v26, %v2728_v25  ;;  %v2070_v57 = vpack.c.bf16 %v2713_v22, %v2708_v21  ;;  %v2281_v58 = vmov 0.0|0.0   ;;  %v2067_v59 = vpack.c.bf16 %v2743_v28, %v2738_v27  ;;  %s2867_s14 = sshll.u32 %s2268_s13, 3  ;;  %s2975_s27 = sld [smem:[#allocation3_spill]]  ;;  %s2268_s13 = sphi %s2849_s13, %s1009_s13   ;;  %v2264_v6 = vphi %v448_v6, %v1538_v6   ;;  %v2260_v10 = vphi %v627_v10, %v1544_v10   ;;  %v2256_v50 = vphi %v801_v50, %v1532_v50   ;;  %v2252_v54 = vphi %v975_v54, %v1548_v54  }
 0x5d6   : > { %2063 = vmatprep.subr.bf16.mxu0 %v2281_v58  ;;  %2069 = vmatprep.subr.bf16.mxu1 %v2281_v58  ;;  %v2073_v60 = vpack.c.bf16 %v2723_v24, %v2718_v23  ;;  %s2976_s5 = sld [smem:[#allocation4_spill]]  ;;  %vm2282_vm6 = vmmov 0   ;;  %v2283_v61 = vmov 0.0   ;;  %v2076_v0 = vpack.c.bf16 %v2753_v30, %v2748_v29  ;;  %s2284_s30 = smov 32  }
 0x5d7   : > { %2065 = vmatpush3.bf16.msra.mxu0 %v2064_v56  ;;  %2071 = vmatpush3.bf16.msra.mxu1 %v2070_v57  ;;  %v2082_v1 = vpack.c.bf16 %v2798_v39, %v2793_v38  ;;  %v2079_v2 = vpack.c.bf16 %v2763_v32, %v2758_v31  ;;  %v2085_v3 = vpack.c.bf16 %v2808_v41, %v2803_v40  ;;  %s2285_s0 = smov 64   ;;  %s2286_s21 = smov 96  }
 0x5d8   : > { %2066 = vmatprep.subr.bf16.mxu0 %v2281_v58  ;;  %2072 = vmatprep.subr.bf16.mxu1 %v2281_v58  ;;  %v2088_v4 = vpack.c.bf16 %v2778_v35, %v2773_v34  ;;  %v2094_v5 = vpack.c.bf16 %v2818_v43, %v2813_v42  ;;  %v2091_v7 = vpack.c.bf16 %v2788_v37, %v2783_v36  ;;  %s1534_s11 = scalar_lea.vmem %s2961_s20, %s2867_s14  ;;  %s1540_s24 = scalar_lea.vmem %s2960_s19, %s2867_s14 }
 0x5d9   : > { %1921 = vmatprep.mubr.msk.f32.mxu0 %vm2282_vm6, %v2283_v61  ;;  %1932 = vmatprep.mubr.msk.f32.mxu1 %vm2282_vm6, %v2283_v61  ;;  %v2097_v8 = vpack.c.bf16 %v2828_v45, %v2823_v44  ;;  %s1009_s13 = sadd.s32 1, %s2268_s13  }
 0x5da   : > { %1482 = vrot.lane.b32.xlu1 %v2252_v54, %s2284_s30  ;;  %p1006_p1 = scmp.ge.s32.totalorder %s1009_s13, 7  }
 0x5db   : > { %s1015_s9 = scalar_lea.vmem %s2975_s27, %s2867_s14  ;;  %2068 = vmatpush3.bf16.msra.mxu0 %v2067_v59  ;;  %2074 = vmatpush3.bf16.msra.mxu1 %v2073_v60 }
 0x5dc   : > { %s2877_s29 = scalar_lea.vmem %s2976_s5, %s2867_s14  ;;  %v1016_v62 = vld [vmem:[%s1015_s9] sm:$0xff]  ;;  %2075 = vmatprep.subr.bf16.mxu0 %v2281_v58  ;;  %2081 = vmatprep.subr.bf16.mxu1 %v2281_v58 }
 0x5dd   : > { %v1018_v63 = vld [vmem:[%s2877_s29] sm:$0xff]  ;;  %v1664_v9 = vld [vmem:[%s2877_s29 + $0x8] sm:$0xff] }
 0x5de   : > { %1922 = vmatmul.mubr.msk.f32.vlgmr.msra.gmra.mrb[0].mxu0 %vm88_vm1, %v1016_v62  ;;  %1933 = vmatmul.mubr.msk.f32.vlgmr.msra.gmra.mrb[0].mxu1 %vm88_vm1, %v1018_v63 }
 0x5df   : > { %2077 = vmatpush3.bf16.msra.mxu0 %v2076_v0  ;;  %2083 = vmatpush3.bf16.msra.mxu1 %v2082_v1 }
 0x5e0   : > { %2078 = vmatprep.subr.bf16.mxu0 %v2281_v58  ;;  %2084 = vmatprep.subr.bf16.mxu1 %v2281_v58 }
 0x5e1   : > { %1943 = vmatprep.mubr.msk.f32.mxu0 %vm2282_vm6, %v2283_v61  ;;  %1954 = vmatprep.mubr.msk.f32.mxu1 %vm2282_vm6, %v2283_v61 }
 0x5e2   : > { %1510 = vrot.lane.b32.xlu1 %v2260_v10, %s2284_s30 }
 0x5e3   : > { %2080 = vmatpush3.bf16.msra.mxu0 %v2079_v2  ;;  %2086 = vmatpush3.bf16.msra.mxu1 %v2085_v3 }
 0x5e4   : > { %2087 = vmatprep.subr.bf16.mxu0 %v2281_v58  ;;  %2093 = vmatprep.subr.bf16.mxu1 %v2281_v58 }
 0x5e6   : > { %1944 = vmatmul.mubr.msk.f32.vlgmr.msra.gmra.mrb[2].mxu0 %vm88_vm1, %v2256_v50  ;;  %1955 = vmatmul.mubr.msk.f32.vlgmr.msra.gmra.mrb[2].mxu1 %vm88_vm1, %v1016_v62 }
 0x5e7   : > { %2089 = vmatpush3.bf16.msra.mxu0 %v2088_v4  ;;  %2095 = vmatpush3.bf16.msra.mxu1 %v2094_v5 }
 0x5e8   : > { %2090 = vmatprep.subr.bf16.mxu0 %v2281_v58  ;;  %2096 = vmatprep.subr.bf16.mxu1 %v2281_v58 }
 0x5e9   : > { %1965 = vmatprep.mubr.msk.f32.mxu0 %vm2282_vm6, %v2283_v61  ;;  %1976 = vmatprep.mubr.msk.f32.mxu1 %vm2282_vm6, %v2283_v61 }
 0x5eb   : > { %2092 = vmatpush3.bf16.msra.mxu0 %v2091_v7  ;;  %2098 = vmatpush3.bf16.msra.mxu1 %v2097_v8 }
 0x5ee   : > { %1966 = vmatmul.mubr.msk.f32.vlgmr.msra.gmra.mrb[4].mxu0 %vm88_vm1, %v1664_v9  ;;  %1977 = vmatmul.mubr.msk.f32.vlgmr.msra.gmra.mrb[4].mxu1 %vm88_vm1, %v2264_v6 }
 0x64c   : > { %v1483_v3 = vpop.permute.xlu1 %1482 }
 0x654   : > { %v1511_v8 = vpop.permute.xlu1 %1510 }
 0x6b1   : > { %v1092_v10 = vpop.f32.mrb[0].mxu0  ;;  %v1165_v11 = vpop.f32.mrb[0].mxu1 }
 0x6b2   : > { %v1923_v48 = vpop.f32.mrb[1].mxu0  ;;  %v1166_v12 = vadd.f32 %v1165_v11, %v1092_v10  ;;  %v1934_v13 = vpop.f32.mrb[1].mxu1 }
 0x6b9   : > { %v1238_v14 = vpop.f32.mrb[2].mxu0  ;;  %v1316_v15 = vpop.f32.mrb[2].mxu1 }
 0x6ba   : > { %v1242_v16 = vadd.f32 %v1238_v14, %v1166_v12  ;;  %v1945_v17 = vpop.f32.mrb[3].mxu0  ;;  %v1956_v18 = vpop.f32.mrb[3].mxu1 }
 0x6bc   : > { %v1249_v19 = vadd.f32 %v2768_v33, %v1242_v16 }
 0x6be   : > { %2190 = vtanh.f32 %v1249_v19  ;;  %v1673_v55 = vmul.f32 -1.442695, %v1249_v19 }
 0x6c1   : > { %v1389_v20 = vpop.f32.mrb[4].mxu0  ;;  %v1462_v47 = vpop.f32.mrb[4].mxu1 }
 0x6c2   : > { %v1390_v49 = vadd.f32 %v1389_v20, %v1316_v15  ;;  %v1967_v50 = vpop.f32.mrb[5].mxu0  ;;  %v1978_v51 = vpop.f32.mrb[5].mxu1 }
 0x6c4   : > { %v1466_v52 = vadd.f32 %v1462_v47, %v1390_v49 }
 0x6c6   : > { %v1473_v6 = vadd.f32 %v2833_v46, %v1466_v52 }
 0x6c8   : > { %v2191_v53 = vpop.eup %2190  ;;  %2192 = vtanh.f32 %v1473_v6  ;;  %v1674_v56 = vmul.f32 -1.442695, %v1473_v6 }
 0x6c9   : > { %1487 = vrot.lane.b32.xlu0 %v2191_v53, %s2285_s0  ;;  %2194 = vpow2.f32 %v1673_v55 }
 0x6ca   : > { %2196 = vpow2.f32 %v1674_v56 }
 0x6d2   : > { %v2193_v54 = vpop.eup %2192 }
 0x6d3   : > { %1515 = vrot.lane.b32.xlu0 %v2193_v54, %s2285_s0  ;;  %v2195_v57 = vpop.eup %2194 }
 0x6d4   : > { %v1477_v58 = vadd.f32 1.0, %v2195_v57  ;;  %v2197_v59 = vpop.eup %2196 }
 0x6d5   : > { %v1505_v60 = vadd.f32 1.0, %v2197_v59 }
 0x6d6   : > { %2198 = vrcp.f32 %v1477_v58 }
 0x6d7   : > { %2200 = vrcp.f32 %v1505_v60 }
 0x6e0   : > { %v2199_v61 = vpop.eup %2198 }
 0x6e1   : > { %v2201_v0 = vpop.eup %2200  ;;  %v1485_v4 = vmul.f32 %v2199_v61, %v1483_v3 }
 0x6e2   : > { %v1513_v9 = vmul.f32 %v2201_v0, %v1511_v8 }
 0x73b   : > { %v1488_v62 = vpop.permute.xlu0 %1487 }
 0x73c   : > { %v1490_v63 = vmul.f32 %v2199_v61, %v1488_v62 }
 0x73e   : > { %1492 = vrot.lane.b32.xlu0 %v1490_v63, %s2284_s30 }
 0x745   : > { %v1516_v1 = vpop.permute.xlu0 %1515 }
 0x746   : > { %v1518_v2 = vmul.f32 %v2201_v0, %v1516_v1 }
 0x748   : > { %1520 = vrot.lane.b32.xlu1 %v1518_v2, %s2284_s30 }
 0x7b0   : > { %v1493_v5 = vpop.permute.xlu0 %1492 }
 0x7b1   : > { %v1495_v7 = vadd.f32 %v1493_v5, %v1485_v4 }
 0x7b3   : > { %2202 = vtanh.f32 %v1495_v7 }
 0x7ba   : > { %v1521_v10 = vpop.permute.xlu1 %1520 }
 0x7bb   : > { %v1523_v11 = vadd.f32 %v1521_v10, %v1513_v9 }
 0x7bd   : > { %v2203_v48 = vpop.eup %2202  ;;  %2204 = vtanh.f32 %v1523_v11 }
 0x7be   : > { %1498 = vrot.lane.b32.xlu0 %v2203_v48, %s2285_s0 }
 0x7c7   : > { %v2205_v12 = vpop.eup %2204 }
 0x7c8   : > { %1526 = vrot.lane.b32.xlu1 %v2205_v12, %s2285_s0 }
 0x830   : > { %v1499_v13 = vpop.permute.xlu0 %1498 }
 0x831   : > { %v1501_v14 = vmul.f32 %v2199_v61, %v1499_v13 }
 0x833   : > { %1531 = vrot.lane.b32.xlu0 %v1501_v14, %s2284_s30 }
 0x837   : > { %1543 = vrot.lane.b32.xlu0 %v1523_v11, %s2286_s21 }
 0x83a   : > { %v1527_v15 = vpop.permute.xlu1 %1526 }
 0x83b   : > { %v1529_v16 = vmul.f32 %v2201_v0, %v1527_v15 }
 0x83d   : > { %1537 = vrot.lane.b32.xlu1 %v1529_v16, %s2284_s30 }
 0x841   : > { %1547 = vrot.lane.b32.xlu1 %v1495_v7, %s2286_s21 }
 0x8a5   : > { %v1532_v50 = vpop.permute.xlu0 %1531  }
 0x8a6   : > { %1535 = vst.msk [vmem:[%s1534_s11] sm:$0xff] %vm88_vm1, %v1532_v50 }
 0x8a9   : > { %v1544_v10 = vpop.permute.xlu0 %1543  }
 0x8ad   :  { %1008 = sbr.rel (!%p1006_p1) target bundleno = 1493 (0x5d5), region = 147 }
 0x8af   : > { %v1538_v6 = vpop.permute.xlu1 %1537  }
 0x8b0   : > { %1541 = vst.msk [vmem:[%s1540_s24] sm:$0xff] %vm88_vm1, %v1538_v6 }
 0x8b3   : > { %v1548_v54 = vpop.permute.xlu1 %1547  }

</bundles_post_ra>
